<compile_context>
chip_gen: v6e
topology: v6e:2x2x1
jax: 0.10.0
libtpu: 0.0.40
codegen_flags: <defaults>
</compile_context>

<pallas_src>
import math
from functools import partial

import jax
import jax.numpy as jnp
from jax.experimental import pallas as pl
from jax.experimental.pallas import tpu as pltpu


# ----------------------------- in-kernel helpers ----------------------------


def _gelu(x):
    # exact (erf) GELU, matching torch F.gelu default
    return 0.5 * x * (1.0 + jax.lax.erf(x * 0.7071067811865476))


def _ln(x, g, b, eps):
    mu = jnp.mean(x, axis=-1, keepdims=True)
    var = jnp.mean(jnp.square(x - mu), axis=-1, keepdims=True)
    return (x - mu) * jax.lax.rsqrt(var + eps) * g + b


def _round_up(x, m):
    return ((x + m - 1) // m) * m


def _vmem_limit_bytes(*block_nbytes):
    est = 2 * int(sum(block_nbytes))              # double-buffered pipeline copies
    return int(min(max(3 * est + (8 << 20), 16 << 20), 48 << 20))


# --------------------------- fused matmul kernel -----------------------------


def _apply_epilogue(y, extra_refs, epilogue, eps):
    """y is the f32 (bias-added) matmul result for one output block."""
    if epilogue == "gelu":
        return _gelu(y)
    if epilogue == "res_ln":                       # LayerNorm(residual + y)
        res_ref, g_ref, b_ref = extra_refs
        return _ln(res_ref[...].astype(jnp.float32) + y, g_ref[...], b_ref[...], eps)
    if epilogue == "gelu_ln":                      # LayerNorm(GELU(y))
        g_ref, b_ref = extra_refs
        return _ln(_gelu(y), g_ref[...], b_ref[...], eps)
    return y


def _fused_linear_kernel(*refs, epilogue, eps, n_k):
    if n_k == 1:
        # Single K step: no accumulator scratch, produce the output block directly.
        x_ref, w_ref, b_ref = refs[0], refs[1], refs[2]
        o_ref = refs[-1]
        extra = refs[3:-1]
        acc = jnp.dot(x_ref[...], w_ref[...], preferred_element_type=jnp.float32)
        y = _apply_epilogue(acc + b_ref[...], extra, epilogue, eps)
        o_ref[...] = y.astype(o_ref.dtype)
    else:
        # Split-K: f32 VMEM accumulator, epilogue on the last K step.
        x_ref, w_ref, b_ref = refs[0], refs[1], refs[2]
        o_ref, acc_ref = refs[-2], refs[-1]
        extra = refs[3:-2]

        @pl.when(pl.program_id(2) == 0)
        def _():
            acc_ref[...] = jnp.zeros_like(acc_ref)

        acc_ref[...] += jnp.dot(x_ref[...], w_ref[...],
                                preferred_element_type=jnp.float32)

        @pl.when(pl.program_id(2) == n_k - 1)
        def _():
            y = _apply_epilogue(acc_ref[...] + b_ref[...], extra, epilogue, eps)
            o_ref[...] = y.astype(o_ref.dtype)


def _row_tile(M):
    """(tm, M_pad): tm capped at 256; M padded to a multiple of tm when needed."""
    if M <= 256:
        mp = _round_up(M, 8)
        return mp, mp
    for t in (256, 128):
        if M % t == 0:
            return t, M
    return 256, _round_up(M, 256)


def _col_tile(N):
    if N <= 512:
        return N
    for t in (512, 256, 128):
        if N % t == 0:
            return t
    return N


def _k_tile(K):
    if K <= 2048:
        return K
    for t in (2048, 1024, 512, 256, 128):
        if K % t == 0:
            return t
    return K


def fused_linear(x, w, b, *, epilogue="none", extras=(), eps=1e-5,
                 out_dtype=jnp.bfloat16):
    """y = epilogue(x @ w + b [, extras]);  x:(M,K), w:(K,N), b:(N,) -> (M,N).

    Matmul operands in bf16, f32 accumulation, f32 epilogue, output cast to
    out_dtype.  Epilogues: none | gelu | res_ln (LayerNorm(res + y)) |
    gelu_ln (LayerNorm(GELU(y))).
    """
    M, K = x.shape
    N = w.shape[1]

    x = x.astype(jnp.bfloat16)
    w = w.astype(jnp.bfloat16)
    b2 = b.reshape(1, N).astype(jnp.float32)

    tm, M_pad = _row_tile(M)
    tn = N if epilogue in ("res_ln", "gelu_ln") else _col_tile(N)
    tk = _k_tile(K)
    n_k = K // tk

    in_specs = [
        pl.BlockSpec((tm, tk), lambda i, j, k: (i, k)),
        pl.BlockSpec((tk, tn), lambda i, j, k: (k, j)),
        pl.BlockSpec((1, tn), lambda i, j, k: (0, j)),
    ]
    extra_arrays = []
    blk_bytes = [tm * tk * 2, tk * tn * 2, tn * 4,
                 tm * tn * jnp.dtype(out_dtype).itemsize]

    if epilogue == "res_ln":
        res, g, bet = extras
        res = res.astype(jnp.bfloat16)
        if M_pad != M:
            res = jnp.pad(res, ((0, M_pad - M), (0, 0)))
        in_specs += [
            pl.BlockSpec((tm, tn), lambda i, j, k: (i, j)),     # residual
            pl.BlockSpec((1, tn), lambda i, j, k: (0, j)),      # gamma
            pl.BlockSpec((1, tn), lambda i, j, k: (0, j)),      # beta
        ]
        extra_arrays = [res,
                        g.reshape(1, N).astype(jnp.float32),
                        bet.reshape(1, N).astype(jnp.float32)]
        blk_bytes += [tm * tn * 2, tn * 4, tn * 4]
    elif epilogue == "gelu_ln":
        g, bet = extras
        in_specs += [
            pl.BlockSpec((1, tn), lambda i, j, k: (0, j)),      # gamma
            pl.BlockSpec((1, tn), lambda i, j, k: (0, j)),      # beta
        ]
        extra_arrays = [g.reshape(1, N).astype(jnp.float32),
                        bet.reshape(1, N).astype(jnp.float32)]
        blk_bytes += [tn * 4, tn * 4]

    if M_pad != M:
        x = jnp.pad(x, ((0, M_pad - M), (0, 0)))

    scratch = []
    if n_k > 1:
        scratch = [pltpu.VMEM((tm, tn), jnp.float32)]
        blk_bytes += [tm * tn * 4]

    out = pl.pallas_call(
        partial(_fused_linear_kernel, epilogue=epilogue, eps=eps, n_k=n_k),
        out_shape=jax.ShapeDtypeStruct((M_pad, N), out_dtype),
        grid=(M_pad // tm, N // tn, n_k),
        in_specs=in_specs,
        out_specs=pl.BlockSpec((tm, tn), lambda i, j, k: (i, j)),
        scratch_shapes=scratch,
        compiler_params=pltpu.CompilerParams(
            dimension_semantics=("parallel", "parallel", "arbitrary"),
            vmem_limit_bytes=_vmem_limit_bytes(*blk_bytes)),
    )(x, w, b2, *extra_arrays)

    return out[:M] if M_pad != M else out


# ---------------------- InputProcess + PositionalEncoding --------------------


def _inproc_pe_kernel(tok_ref, w_ref, b_ref, pe_ref, o_ref):
    # tok block (1, n, code_dim); w (code_dim, D); b (1, D); pe (n, D); out (1, n, D)
    y = jnp.dot(tok_ref[0], w_ref[...], preferred_element_type=jnp.float32)
    o_ref[0] = (y + b_ref[...] + pe_ref[...]).astype(o_ref.dtype)


def input_process_pe(tok, w, b, pe):
    """poseEmbedding(tok) + positional encoding, per batch element (no (B*n, D)
    broadcast of the PE buffer in HBM). tok:(B,n,Kc) -> (B,n,D) bf16."""
    B, n, Kc = tok.shape
    D = w.shape[1]
    vmem = _vmem_limit_bytes(n * Kc * 2, Kc * D * 2, D * 4, n * D * 4, n * D * 2)
    return pl.pallas_call(
        _inproc_pe_kernel,
        out_shape=jax.ShapeDtypeStruct((B, n, D), jnp.bfloat16),
        grid=(B,),
        in_specs=[
            pl.BlockSpec((1, n, Kc), lambda bb: (bb, 0, 0)),
            pl.BlockSpec((Kc, D), lambda bb: (0, 0)),     # resident across the grid
            pl.BlockSpec((1, D), lambda bb: (0, 0)),
            pl.BlockSpec((n, D), lambda bb: (0, 0)),
        ],
        out_specs=pl.BlockSpec((1, n, D), lambda bb: (bb, 0, 0)),
        compiler_params=pltpu.CompilerParams(
            dimension_semantics=("parallel",), vmem_limit_bytes=vmem),
    )(tok.astype(jnp.bfloat16), w.astype(jnp.bfloat16),
      b.reshape(1, D).astype(jnp.float32), pe.astype(jnp.float32))


# ------------------------------ attention kernel -----------------------------


def _attn_kernel(qkv_ref, o_ref, *, num_heads):
    # qkv block: (1, T, 3D) bf16 (q-scale already folded into the projection weights).
    T = qkv_ref.shape[1]
    D = qkv_ref.shape[2] // 3
    Dh = D // num_heads

    # Bug-compatible with the reference: torch.tril(ones) is a FLOAT mask, so it is
    # ADDED to the scores (+1 on allowed positions, 0 elsewhere) -> no real masking.
    rows = jax.lax.broadcasted_iota(jnp.int32, (T, T), 0)
    cols = jax.lax.broadcasted_iota(jnp.int32, (T, T), 1)
    mask_add = jnp.where(cols <= rows, 1.0, 0.0).astype(jnp.float32)

    for h in range(num_heads):                      # static head loop, 2-D MXU dots
        q = qkv_ref[0, :, h * Dh:(h + 1) * Dh]                  # (T, Dh) bf16
        k = qkv_ref[0, :, D + h * Dh:D + (h + 1) * Dh]
        v = qkv_ref[0, :, 2 * D + h * Dh:2 * D + (h + 1) * Dh]
        s = jax.lax.dot_general(q, k, (((1,), (1,)), ((), ())),
                                preferred_element_type=jnp.float32)
        s = s + mask_add
        s = s - jnp.max(s, axis=-1, keepdims=True)
        p = jnp.exp(s)
        p = p * pl.reciprocal(jnp.sum(p, axis=-1, keepdims=True), approx=True)
        head = jnp.dot(p.astype(v.dtype), v, preferred_element_type=jnp.float32)
        o_ref[0, :, h * Dh:(h + 1) * Dh] = head.astype(o_ref.dtype)   # per-head store


def attention(qkv, num_heads):
    """qkv: (B, T, 3D) packed q|k|v (bf16) -> (B, T, D) bf16."""
    # TODO(synk): for long sequences (T >= 512) switch to a KV-tiled online-softmax grid.
    B, T, threeD = qkv.shape
    D = threeD // 3
    vmem = _vmem_limit_bytes(T * threeD * 2, T * D * 2, T * T * 4)
    return pl.pallas_call(
        partial(_attn_kernel, num_heads=num_heads),
        out_shape=jax.ShapeDtypeStruct((B, T, D), jnp.bfloat16),
        grid=(B,),
        in_specs=[pl.BlockSpec((1, T, threeD), lambda bb: (bb, 0, 0))],
        out_specs=pl.BlockSpec((1, T, D), lambda bb: (bb, 0, 0)),
        compiler_params=pltpu.CompilerParams(
            dimension_semantics=("parallel",), vmem_limit_bytes=vmem),
    )(qkv.astype(jnp.bfloat16))


# --------------------------- parameter construction -------------------------


def init_params(key, *, code_dim, latent_dim, ff_size, num_layers, num_heads,
                clip_dim, num_tokens, max_len=64):
    """Synthetic parameters: weights ~ N(0, 0.02), biases zero, LN gamma=1/beta=0,
    matching MaskTransformer.__init_weights.  Matmul weights stored in bf16,
    1/sqrt(Dh) folded into the q columns of in_proj_w, out_final pre-padded to a
    128-multiple lane width."""
    keys = iter(jax.random.split(key, 64))

    def w(shape):
        return 0.02 * jax.random.normal(next(keys), shape, jnp.float32)

    def z(shape):
        return jnp.zeros(shape, jnp.float32)

    bf = jnp.bfloat16
    Vp = _round_up(num_tokens, 128)

    p = {
        "token_emb": w((num_tokens + 2, code_dim)),                # nn.Embedding
        "inproc_w": w((code_dim, latent_dim)).astype(bf),          # InputProcess.poseEmbedding
        "inproc_b": z((latent_dim,)),
        "cond_w": w((clip_dim, latent_dim)).astype(bf),            # cond_emb (text mode)
        "cond_b": z((latent_dim,)),
        "out_dense_w": w((latent_dim, latent_dim)).astype(bf),     # OutputProcess_Bert.dense
        "out_dense_b": z((latent_dim,)),
        "out_ln_g": jnp.ones((latent_dim,), jnp.float32),
        "out_ln_b": z((latent_dim,)),
        # OutputProcess_Bert.poseFinal, pre-padded to Vp lanes (dense vst).
        "out_final_w": jnp.zeros((latent_dim, Vp), jnp.float32)
                          .at[:, :num_tokens].set(w((latent_dim, num_tokens))).astype(bf),
        "out_final_b": jnp.zeros((Vp,), jnp.float32),
        "layers": [],
    }

    # Fold 1/sqrt(Dh) into the q columns of the packed qkv projection (mathematically
    # identical to scaling the q activations inside attention; bias is zero anyway).
    Dh = latent_dim // num_heads
    qscale = 1.0 / math.sqrt(Dh)
    col_scale = jnp.concatenate([jnp.full((latent_dim,), qscale, jnp.float32),
                                 jnp.ones((2 * latent_dim,), jnp.float32)])
    for _ in range(num_layers):
        p["layers"].append({
            "in_proj_w": (w((latent_dim, 3 * latent_dim)) * col_scale[None, :]).astype(bf),
            "in_proj_b": z((3 * latent_dim,)),
            "out_proj_w": w((latent_dim, latent_dim)).astype(bf),
            "out_proj_b": z((latent_dim,)),
            "ln1_g": jnp.ones((latent_dim,), jnp.float32),
            "ln1_b": z((latent_dim,)),
            "w1": w((latent_dim, ff_size)).astype(bf),
            "b1": z((ff_size,)),
            "w2": w((ff_size, latent_dim)).astype(bf),
            "b2": z((latent_dim,)),
            "ln2_g": jnp.ones((latent_dim,), jnp.float32),
            "ln2_b": z((latent_dim,)),
        })

    # PositionalEncoding buffer: sin on even, cos on odd channels (kept (max_len, D)).
    position = jnp.arange(max_len, dtype=jnp.float32)[:, None]
    div_term = jnp.exp(
        jnp.arange(0, latent_dim, 2, dtype=jnp.float32) * (-math.log(10000.0) / latent_dim))
    pe = jnp.stack([jnp.sin(position * div_term), jnp.cos(position * div_term)],
                   axis=-1).reshape(max_len, latent_dim)
    p["pe"] = pe
    return p


# ------------------------------- forward pass -------------------------------


def trans_forward(params, motion_ids, cond, *, num_heads, num_tokens):
    """Equivalent of MaskTransformer.trans_forward (eval, force_mask=False).

    motion_ids: (B, n) int32, cond: (B, clip_dim) f32 -> logits (B, num_tokens, n)
    Internally batch-first (B, T, D) in bf16; row-wise ops are order-agnostic so
    results match the sequence-first PyTorch reference (up to bf16 drift).
    """
    B, n = motion_ids.shape
    D = params["inproc_w"].shape[1]
    V = num_tokens

    # token embedding (gather = XLA glue)
    tok = jnp.take(params["token_emb"], motion_ids, axis=0)            # (B, n, code_dim)

    # InputProcess linear fused with the positional-encoding add (dropout = identity).
    x = input_process_pe(tok, params["inproc_w"], params["inproc_b"], params["pe"][:n])

    # cond_emb (mask_cond is identity for eval / force_mask=False)
    c = fused_linear(cond, params["cond_w"], params["cond_b"])          # (B, D) bf16

    # prepend condition token: (B, T, D)
    xseq = jnp.concatenate([c[:, None, :], x], axis=1)
    T = n + 1
    h2d = xseq.reshape(B * T, D)

    for lp in params["layers"]:
        # --- multi-head self-attention (post-LN encoder layer) ---
        qkv = fused_linear(h2d, lp["in_proj_w"], lp["in_proj_b"])       # (B*T, 3D) bf16
        a = attention(qkv.reshape(B, T, 3 * D), num_heads).reshape(B * T, D)
        # out_proj + residual + LayerNorm1, fused
        h2d = fused_linear(a, lp["out_proj_w"], lp["out_proj_b"],
                           epilogue="res_ln",
                           extras=(h2d, lp["ln1_g"], lp["ln1_b"]), eps=1e-5)
        # --- feed-forward ---
        ff = fused_linear(h2d, lp["w1"], lp["b1"], epilogue="gelu")     # linear1 + GELU
        h2d = fused_linear(ff, lp["w2"], lp["b2"],                      # linear2 + res + LN2
                           epilogue="res_ln",
                           extras=(h2d, lp["ln2_g"], lp["ln2_b"]), eps=1e-5)

    out = h2d.reshape(B, T, D)[:, 1:, :].reshape(B * n, D)              # drop cond token

    # OutputProcess_Bert: dense + GELU + LayerNorm fused, then the final projection
    # against the pre-padded (lane-dense) weight; slice back to num_tokens after.
    h = fused_linear(out, params["out_dense_w"], params["out_dense_b"],
                     epilogue="gelu_ln",
                     extras=(params["out_ln_g"], params["out_ln_b"]), eps=1e-12)
    logits = fused_linear(h, params["out_final_w"], params["out_final_b"],
                          out_dtype=jnp.float32)[:, :V].reshape(B, n, V)
    return jnp.transpose(logits, (0, 2, 1))                             # (B, num_tokens, n)


# ----------------------------------- main ------------------------------------

if __name__ == "__main__":
    # small config consistent with the module
    B, n = 2, 8
    code_dim, latent_dim, ff_size = 16, 32, 64
    num_layers, num_heads = 2, 4
    clip_dim, num_tokens = 32, 24

    key = jax.random.PRNGKey(0)
    pkey, ikey, ckey = jax.random.split(key, 3)

    params = init_params(
        pkey,
        code_dim=code_dim,
        latent_dim=latent_dim,
        ff_size=ff_size,
        num_layers=num_layers,
        num_heads=num_heads,
        clip_dim=clip_dim,
        num_tokens=num_tokens,
    )

    motion_ids = jax.random.randint(ikey, (B, n), 0, num_tokens, dtype=jnp.int32)
    cond_vector = jax.random.normal(ckey, (B, clip_dim), jnp.float32)

    fwd = jax.jit(partial(trans_forward, num_heads=num_heads, num_tokens=num_tokens))
    logits = jax.block_until_ready(fwd(params, motion_ids, cond_vector))
    assert logits.shape == (B, num_tokens, n)
    assert bool(jnp.all(jnp.isfinite(logits)))
    print("KERNEL_OK")
</pallas_src>

<mosaic_0001>
module attributes {stable_mosaic.version = 11 : i64} {
  func.func @_fused_linear_kernel(%arg0: i32, %arg1: i32, %arg2: i32, %arg3: memref<8x32xbf16, #tpu.memory_space<vmem>>, %arg4: memref<32x32xbf16, #tpu.memory_space<vmem>>, %arg5: memref<1x32xf32, #tpu.memory_space<vmem>>, %arg6: memref<8x32xbf16, #tpu.memory_space<vmem>>) attributes {dimension_semantics = [#tpu.dimension_semantics<parallel>, #tpu.dimension_semantics<parallel>, #tpu.dimension_semantics<arbitrary>], iteration_bounds = array<i64: 1, 1, 1>, scalar_prefetch = 0 : i64, scratch_operands = 0 : i64, tpu.core_type = #tpu.core_type<tc>, window_params = [{transform_indices = @transform_0, window_bounds = array<i64: 8, 32>}, {transform_indices = @transform_1, window_bounds = array<i64: 32, 32>}, {transform_indices = @transform_2, window_bounds = array<i64: 1, 32>}, {transform_indices = @transform_3, window_bounds = array<i64: 8, 32>}]} {
    %c0 = arith.constant 0 : index
    %c0_0 = arith.constant 0 : index
    %0 = vector.load %arg3[%c0, %c0_0] : memref<8x32xbf16, #tpu.memory_space<vmem>>, vector<8x32xbf16>
    %c0_1 = arith.constant 0 : index
    %c0_2 = arith.constant 0 : index
    %1 = vector.load %arg4[%c0_1, %c0_2] : memref<32x32xbf16, #tpu.memory_space<vmem>>, vector<32x32xbf16>
    %cst = arith.constant dense<0.000000e+00> : vector<8x32xf32>
    %2 = tpu.matmul %0, %1, %cst {dimension_numbers = #tpu.dot_dimension_numbers<[1], [0], [0], [1], [0, 0, 1, 1], [], []>} : vector<8x32xbf16>, vector<32x32xbf16>, vector<8x32xf32> -> vector<8x32xf32>
    %c0_3 = arith.constant 0 : index
    %c0_4 = arith.constant 0 : index
    %3 = vector.load %arg5[%c0_3, %c0_4] : memref<1x32xf32, #tpu.memory_space<vmem>>, vector<1x32xf32>
    %4 = vector.broadcast %3 : vector<1x32xf32> to vector<8x32xf32>
    %5 = arith.addf %2, %4 : vector<8x32xf32>
    %6 = arith.truncf %5 : vector<8x32xf32> to vector<8x32xbf16>
    %c0_5 = arith.constant 0 : index
    %c0_6 = arith.constant 0 : index
    %7 = vector.load %arg6[%c0_5, %c0_6] : memref<8x32xbf16, #tpu.memory_space<vmem>>, vector<8x32xbf16>
    tpu.vector_store %arg6[%c0_5, %c0_6], %6 {strides = array<i32>} : memref<8x32xbf16, #tpu.memory_space<vmem>>, vector<8x32xbf16>,
    return
  }
  func.func @transform_0(%arg0: i32, %arg1: i32, %arg2: i32) -> (i32, i32) {
    %c0_i32 = arith.constant 0 : i32
    return %arg0, %arg2 : i32, i32
  }
  func.func @transform_1(%arg0: i32, %arg1: i32, %arg2: i32) -> (i32, i32) {
    %c0_i32 = arith.constant 0 : i32
    return %arg2, %arg1 : i32, i32
  }
  func.func @transform_2(%arg0: i32, %arg1: i32, %arg2: i32) -> (i32, i32) {
    %c0_i32 = arith.constant 0 : i32
    %c0_i32_0 = arith.constant 0 : i32
    return %c0_i32, %arg1 : i32, i32
  }
  func.func @transform_3(%arg0: i32, %arg1: i32, %arg2: i32) -> (i32, i32) {
    %c0_i32 = arith.constant 0 : i32
    return %arg0, %arg1 : i32, i32
  }
}

module attributes {stable_mosaic.version = 11 : i64} {
  func.func @_fused_linear_kernel(%arg0: i32, %arg1: i32, %arg2: i32, %arg3: memref<24x32xbf16, #tpu.memory_space<vmem>>, %arg4: memref<32x96xbf16, #tpu.memory_space<vmem>>, %arg5: memref<1x96xf32, #tpu.memory_space<vmem>>, %arg6: memref<24x96xbf16, #tpu.memory_space<vmem>>) attributes {dimension_semantics = [#tpu.dimension_semantics<parallel>, #tpu.dimension_semantics<parallel>, #tpu.dimension_semantics<arbitrary>], iteration_bounds = array<i64: 1, 1, 1>, scalar_prefetch = 0 : i64, scratch_operands = 0 : i64, tpu.core_type = #tpu.core_type<tc>, window_params = [{transform_indices = @transform_0, window_bounds = array<i64: 24, 32>}, {transform_indices = @transform_1, window_bounds = array<i64: 32, 96>}, {transform_indices = @transform_2, window_bounds = array<i64: 1, 96>}, {transform_indices = @transform_3, window_bounds = array<i64: 24, 96>}]} {
    %c0 = arith.constant 0 : index
    %c0_0 = arith.constant 0 : index
    %0 = vector.load %arg3[%c0, %c0_0] : memref<24x32xbf16, #tpu.memory_space<vmem>>, vector<24x32xbf16>
    %c0_1 = arith.constant 0 : index
    %c0_2 = arith.constant 0 : index
    %1 = vector.load %arg4[%c0_1, %c0_2] : memref<32x96xbf16, #tpu.memory_space<vmem>>, vector<32x96xbf16>
    %cst = arith.constant dense<0.000000e+00> : vector<24x96xf32>
    %2 = tpu.matmul %0, %1, %cst {dimension_numbers = #tpu.dot_dimension_numbers<[1], [0], [0], [1], [0, 0, 1, 1], [], []>} : vector<24x32xbf16>, vector<32x96xbf16>, vector<24x96xf32> -> vector<24x96xf32>
    %c0_3 = arith.constant 0 : index
    %c0_4 = arith.constant 0 : index
    %3 = vector.load %arg5[%c0_3, %c0_4] : memref<1x96xf32, #tpu.memory_space<vmem>>, vector<1x96xf32>
    %4 = vector.broadcast %3 : vector<1x96xf32> to vector<24x96xf32>
    %5 = arith.addf %2, %4 : vector<24x96xf32>
    %6 = arith.truncf %5 : vector<24x96xf32> to vector<24x96xbf16>
    %c0_5 = arith.constant 0 : index
    %c0_6 = arith.constant 0 : index
    %7 = vector.load %arg6[%c0_5, %c0_6] : memref<24x96xbf16, #tpu.memory_space<vmem>>, vector<24x96xbf16>
    tpu.vector_store %arg6[%c0_5, %c0_6], %6 {strides = array<i32>} : memref<24x96xbf16, #tpu.memory_space<vmem>>, vector<24x96xbf16>,
    return
  }
  func.func @transform_0(%arg0: i32, %arg1: i32, %arg2: i32) -> (i32, i32) {
    %c0_i32 = arith.constant 0 : i32
    return %arg0, %arg2 : i32, i32
  }
  func.func @transform_1(%arg0: i32, %arg1: i32, %arg2: i32) -> (i32, i32) {
    %c0_i32 = arith.constant 0 : i32
    return %arg2, %arg1 : i32, i32
  }
  func.func @transform_2(%arg0: i32, %arg1: i32, %arg2: i32) -> (i32, i32) {
    %c0_i32 = arith.constant 0 : i32
    %c0_i32_0 = arith.constant 0 : i32
    return %c0_i32, %arg1 : i32, i32
  }
  func.func @transform_3(%arg0: i32, %arg1: i32, %arg2: i32) -> (i32, i32) {
    %c0_i32 = arith.constant 0 : i32
    return %arg0, %arg1 : i32, i32
  }
}

module attributes {stable_mosaic.version = 11 : i64} {
  func.func @_inproc_pe_kernel(%arg0: i32, %arg1: memref<1x8x16xbf16, #tpu.memory_space<vmem>>, %arg2: memref<16x32xbf16, #tpu.memory_space<vmem>>, %arg3: memref<1x32xf32, #tpu.memory_space<vmem>>, %arg4: memref<8x32xf32, #tpu.memory_space<vmem>>, %arg5: memref<1x8x32xbf16, #tpu.memory_space<vmem>>) attributes {dimension_semantics = [#tpu.dimension_semantics<parallel>], iteration_bounds = array<i64: 2>, scalar_prefetch = 0 : i64, scratch_operands = 0 : i64, tpu.core_type = #tpu.core_type<tc>, window_params = [{transform_indices = @transform_0, window_bounds = array<i64: 1, 8, 16>}, {pipeline_mode = #tpu.pipeline_mode<synchronous>, transform_indices = @transform_1, window_bounds = array<i64: 16, 32>}, {pipeline_mode = #tpu.pipeline_mode<synchronous>, transform_indices = @transform_2, window_bounds = array<i64: 1, 32>}, {pipeline_mode = #tpu.pipeline_mode<synchronous>, transform_indices = @transform_3, window_bounds = array<i64: 8, 32>}, {transform_indices = @transform_4, window_bounds = array<i64: 1, 8, 32>}]} {
    %c0 = arith.constant 0 : index
    %c0_0 = arith.constant 0 : index
    %c0_1 = arith.constant 0 : index
    %0 = vector.load %arg1[%c0, %c0_0, %c0_1] : memref<1x8x16xbf16, #tpu.memory_space<vmem>>, vector<1x8x16xbf16>
    %1 = vector.shape_cast %0 : vector<1x8x16xbf16> to vector<8x16xbf16>
    %c0_2 = arith.constant 0 : index
    %c0_3 = arith.constant 0 : index
    %2 = vector.load %arg2[%c0_2, %c0_3] : memref<16x32xbf16, #tpu.memory_space<vmem>>, vector<16x32xbf16>
    %cst = arith.constant dense<0.000000e+00> : vector<8x32xf32>
    %3 = tpu.matmul %1, %2, %cst {dimension_numbers = #tpu.dot_dimension_numbers<[1], [0], [0], [1], [0, 0, 1, 1], [], []>} : vector<8x16xbf16>, vector<16x32xbf16>, vector<8x32xf32> -> vector<8x32xf32>
    %c0_4 = arith.constant 0 : index
    %c0_5 = arith.constant 0 : index
    %4 = vector.load %arg3[%c0_4, %c0_5] : memref<1x32xf32, #tpu.memory_space<vmem>>, vector<1x32xf32>
    %5 = vector.broadcast %4 : vector<1x32xf32> to vector<8x32xf32>
    %6 = arith.addf %3, %5 : vector<8x32xf32>
    %c0_6 = arith.constant 0 : index
    %c0_7 = arith.constant 0 : index
    %7 = vector.load %arg4[%c0_6, %c0_7] : memref<8x32xf32, #tpu.memory_space<vmem>>, vector<8x32xf32>
    %8 = arith.addf %6, %7 : vector<8x32xf32>
    %9 = arith.truncf %8 : vector<8x32xf32> to vector<8x32xbf16>
    %c0_8 = arith.constant 0 : index
    %c0_9 = arith.constant 0 : index
    %c0_10 = arith.constant 0 : index
    %10 = vector.load %arg5[%c0_8, %c0_9, %c0_10] : memref<1x8x32xbf16, #tpu.memory_space<vmem>>, vector<1x8x32xbf16>
    %11 = vector.shape_cast %10 : vector<1x8x32xbf16> to vector<8x32xbf16>
    %12 = vector.shape_cast %9 : vector<8x32xbf16> to vector<1x8x32xbf16>
    tpu.vector_store %arg5[%c0_8, %c0_9, %c0_10], %12 {strides = array<i32>} : memref<1x8x32xbf16, #tpu.memory_space<vmem>>, vector<1x8x32xbf16>,
    return
  }
  func.func @transform_0(%arg0: i32) -> (i32, i32, i32) {
    %c0_i32 = arith.constant 0 : i32
    %c0_i32_0 = arith.constant 0 : i32
    %c0_i32_1 = arith.constant 0 : i32
    return %arg0, %c0_i32, %c0_i32_0 : i32, i32, i32
  }
  func.func @transform_1(%arg0: i32) -> (i32, i32) {
    %c0_i32 = arith.constant 0 : i32
    %c0_i32_0 = arith.constant 0 : i32
    %c0_i32_1 = arith.constant 0 : i32
    return %c0_i32, %c0_i32_0 : i32, i32
  }
  func.func @transform_2(%arg0: i32) -> (i32, i32) {
    %c0_i32 = arith.constant 0 : i32
    %c0_i32_0 = arith.constant 0 : i32
    %c0_i32_1 = arith.constant 0 : i32
    return %c0_i32, %c0_i32_0 : i32, i32
  }
  func.func @transform_3(%arg0: i32) -> (i32, i32) {
    %c0_i32 = arith.constant 0 : i32
    %c0_i32_0 = arith.constant 0 : i32
    %c0_i32_1 = arith.constant 0 : i32
    return %c0_i32, %c0_i32_0 : i32, i32
  }
  func.func @transform_4(%arg0: i32) -> (i32, i32, i32) {
    %c0_i32 = arith.constant 0 : i32
    %c0_i32_0 = arith.constant 0 : i32
    %c0_i32_1 = arith.constant 0 : i32
    return %arg0, %c0_i32, %c0_i32_0 : i32, i32, i32
  }
}

module attributes {stable_mosaic.version = 11 : i64} {
  func.func @_attn_kernel(%arg0: i32, %arg1: memref<1x9x96xbf16, #tpu.memory_space<vmem>>, %arg2: memref<1x9x32xbf16, #tpu.memory_space<vmem>>) attributes {dimension_semantics = [#tpu.dimension_semantics<parallel>], iteration_bounds = array<i64: 2>, scalar_prefetch = 0 : i64, scratch_operands = 0 : i64, tpu.core_type = #tpu.core_type<tc>, window_params = [{transform_indices = @transform_0, window_bounds = array<i64: 1, 9, 96>}, {transform_indices = @transform_1, window_bounds = array<i64: 1, 9, 32>}]} {
    %0 = tpu.iota {dimensions = array<i32: 0>} : vector<9x9xi32>
    %1 = tpu.iota {dimensions = array<i32: 1>} : vector<9x9xi32>
    %2 = arith.cmpi sle, %1, %0 : vector<9x9xi32>
    %cst = arith.constant 1.000000e+00 : f32
    %cst_0 = arith.constant 0.000000e+00 : f32
    %3 = vector.broadcast %cst : f32 to vector<9x9xf32>
    %4 = vector.broadcast %cst_0 : f32 to vector<9x9xf32>
    %5 = arith.select %2, %3, %4 : vector<9x9xi1>, vector<9x9xf32>
    %c0 = arith.constant 0 : index
    %c0_1 = arith.constant 0 : index
    %c0_2 = arith.constant 0 : index
    %6 = vector.load %arg1[%c0, %c0_1, %c0_2] : memref<1x9x96xbf16, #tpu.memory_space<vmem>>, vector<1x9x8xbf16>
    %7 = vector.shape_cast %6 : vector<1x9x8xbf16> to vector<9x8xbf16>
    %c0_3 = arith.constant 0 : index
    %c0_4 = arith.constant 0 : index
    %c32 = arith.constant 32 : index
    %8 = vector.load %arg1[%c0_3, %c0_4, %c32] : memref<1x9x96xbf16, #tpu.memory_space<vmem>>, vector<1x9x8xbf16>
    %9 = vector.shape_cast %8 : vector<1x9x8xbf16> to vector<9x8xbf16>
    %c0_5 = arith.constant 0 : index
    %c0_6 = arith.constant 0 : index
    %c64 = arith.constant 64 : index
    %10 = vector.load %arg1[%c0_5, %c0_6, %c64] : memref<1x9x96xbf16, #tpu.memory_space<vmem>>, vector<1x9x8xbf16>
    %11 = vector.shape_cast %10 : vector<1x9x8xbf16> to vector<9x8xbf16>
    %cst_7 = arith.constant dense<0.000000e+00> : vector<9x9xf32>
    %12 = tpu.matmul %7, %9, %cst_7 {dimension_numbers = #tpu.dot_dimension_numbers<[1], [1], [0], [0], [0, 0, 1, 0], [], []>} : vector<9x8xbf16>, vector<9x8xbf16>, vector<9x9xf32> -> vector<9x9xf32>
    %13 = arith.addf %12, %5 : vector<9x9xf32>
    %cst_8 = arith.constant dense<0xFF800000> : vector<9xf32>
    %14 = vector.multi_reduction <maximumf>, %13, %cst_8 [1] : vector<9x9xf32> to vector<9xf32>
    %15 = vector.shape_cast %14 : vector<9xf32> to vector<9x1xf32>
    %16 = vector.broadcast %15 : vector<9x1xf32> to vector<9x9xf32>
    %17 = arith.subf %13, %16 : vector<9x9xf32>
    %18 = math.exp %17 : vector<9x9xf32>
    %cst_9 = arith.constant dense<0.000000e+00> : vector<9xf32>
    %19 = vector.multi_reduction <add>, %18, %cst_9 [1] : vector<9x9xf32> to vector<9xf32>
    %20 = vector.shape_cast %19 : vector<9xf32> to vector<9x1xf32>
    %21 = tpu.reciprocal %20 {approx = true} : vector<9x1xf32> -> vector<9x1xf32>
    %22 = vector.broadcast %21 : vector<9x1xf32> to vector<9x9xf32>
    %23 = arith.mulf %18, %22 : vector<9x9xf32>
    %24 = arith.truncf %23 : vector<9x9xf32> to vector<9x9xbf16>
    %cst_10 = arith.constant dense<0.000000e+00> : vector<9x8xf32>
    %25 = tpu.matmul %24, %11, %cst_10 {dimension_numbers = #tpu.dot_dimension_numbers<[1], [0], [0], [1], [0, 0, 1, 1], [], []>} : vector<9x9xbf16>, vector<9x8xbf16>, vector<9x8xf32> -> vector<9x8xf32>
    %26 = arith.truncf %25 : vector<9x8xf32> to vector<9x8xbf16>
    %c0_11 = arith.constant 0 : index
    %c0_12 = arith.constant 0 : index
    %c0_13 = arith.constant 0 : index
    %27 = vector.load %arg2[%c0_11, %c0_12, %c0_13] : memref<1x9x32xbf16, #tpu.memory_space<vmem>>, vector<1x9x8xbf16>
    %28 = vector.shape_cast %27 : vector<1x9x8xbf16> to vector<9x8xbf16>
    %29 = vector.shape_cast %26 : vector<9x8xbf16> to vector<1x9x8xbf16>
    tpu.vector_store %arg2[%c0_11, %c0_12, %c0_13], %29 {strides = array<i32>} : memref<1x9x32xbf16, #tpu.memory_space<vmem>>, vector<1x9x8xbf16>,
    %c0_14 = arith.constant 0 : index
    %c0_15 = arith.constant 0 : index
    %c8 = arith.constant 8 : index
    %30 = vector.load %arg1[%c0_14, %c0_15, %c8] : memref<1x9x96xbf16, #tpu.memory_space<vmem>>, vector<1x9x8xbf16>
    %31 = vector.shape_cast %30 : vector<1x9x8xbf16> to vector<9x8xbf16>
    %c0_16 = arith.constant 0 : index
    %c0_17 = arith.constant 0 : index
    %c40 = arith.constant 40 : index
    %32 = vector.load %arg1[%c0_16, %c0_17, %c40] : memref<1x9x96xbf16, #tpu.memory_space<vmem>>, vector<1x9x8xbf16>
    %33 = vector.shape_cast %32 : vector<1x9x8xbf16> to vector<9x8xbf16>
    %c0_18 = arith.constant 0 : index
    %c0_19 = arith.constant 0 : index
    %c72 = arith.constant 72 : index
    %34 = vector.load %arg1[%c0_18, %c0_19, %c72] : memref<1x9x96xbf16, #tpu.memory_space<vmem>>, vector<1x9x8xbf16>
    %35 = vector.shape_cast %34 : vector<1x9x8xbf16> to vector<9x8xbf16>
    %cst_20 = arith.constant dense<0.000000e+00> : vector<9x9xf32>
    %36 = tpu.matmul %31, %33, %cst_20 {dimension_numbers = #tpu.dot_dimension_numbers<[1], [1], [0], [0], [0, 0, 1, 0], [], []>} : vector<9x8xbf16>, vector<9x8xbf16>, vector<9x9xf32> -> vector<9x9xf32>
    %37 = arith.addf %36, %5 : vector<9x9xf32>
    %cst_21 = arith.constant dense<0xFF800000> : vector<9xf32>
    %38 = vector.multi_reduction <maximumf>, %37, %cst_21 [1] : vector<9x9xf32> to vector<9xf32>
    %39 = vector.shape_cast %38 : vector<9xf32> to vector<9x1xf32>
    %40 = vector.broadcast %39 : vector<9x1xf32> to vector<9x9xf32>
    %41 = arith.subf %37, %40 : vector<9x9xf32>
    %42 = math.exp %41 : vector<9x9xf32>
    %cst_22 = arith.constant dense<0.000000e+00> : vector<9xf32>
    %43 = vector.multi_reduction <add>, %42, %cst_22 [1] : vector<9x9xf32> to vector<9xf32>
    %44 = vector.shape_cast %43 : vector<9xf32> to vector<9x1xf32>
    %45 = tpu.reciprocal %44 {approx = true} : vector<9x1xf32> -> vector<9x1xf32>
    %46 = vector.broadcast %45 : vector<9x1xf32> to vector<9x9xf32>
    %47 = arith.mulf %42, %46 : vector<9x9xf32>
    %48 = arith.truncf %47 : vector<9x9xf32> to vector<9x9xbf16>
    %cst_23 = arith.constant dense<0.000000e+00> : vector<9x8xf32>
    %49 = tpu.matmul %48, %35, %cst_23 {dimension_numbers = #tpu.dot_dimension_numbers<[1], [0], [0], [1], [0, 0, 1, 1], [], []>} : vector<9x9xbf16>, vector<9x8xbf16>, vector<9x8xf32> -> vector<9x8xf32>
    %50 = arith.truncf %49 : vector<9x8xf32> to vector<9x8xbf16>
    %c0_24 = arith.constant 0 : index
    %c0_25 = arith.constant 0 : index
    %c8_26 = arith.constant 8 : index
    %51 = vector.load %arg2[%c0_24, %c0_25, %c8_26] : memref<1x9x32xbf16, #tpu.memory_space<vmem>>, vector<1x9x8xbf16>
    %52 = vector.shape_cast %51 : vector<1x9x8xbf16> to vector<9x8xbf16>
    %53 = vector.shape_cast %50 : vector<9x8xbf16> to vector<1x9x8xbf16>
    tpu.vector_store %arg2[%c0_24, %c0_25, %c8_26], %53 {strides = array<i32>} : memref<1x9x32xbf16, #tpu.memory_space<vmem>>, vector<1x9x8xbf16>,
    %c0_27 = arith.constant 0 : index
    %c0_28 = arith.constant 0 : index
    %c16 = arith.constant 16 : index
    %54 = vector.load %arg1[%c0_27, %c0_28, %c16] : memref<1x9x96xbf16, #tpu.memory_space<vmem>>, vector<1x9x8xbf16>
    %55 = vector.shape_cast %54 : vector<1x9x8xbf16> to vector<9x8xbf16>
    %c0_29 = arith.constant 0 : index
    %c0_30 = arith.constant 0 : index
    %c48 = arith.constant 48 : index
    %56 = vector.load %arg1[%c0_29, %c0_30, %c48] : memref<1x9x96xbf16, #tpu.memory_space<vmem>>, vector<1x9x8xbf16>
    %57 = vector.shape_cast %56 : vector<1x9x8xbf16> to vector<9x8xbf16>
    %c0_31 = arith.constant 0 : index
    %c0_32 = arith.constant 0 : index
    %c80 = arith.constant 80 : index
    %58 = vector.load %arg1[%c0_31, %c0_32, %c80] : memref<1x9x96xbf16, #tpu.memory_space<vmem>>, vector<1x9x8xbf16>
    %59 = vector.shape_cast %58 : vector<1x9x8xbf16> to vector<9x8xbf16>
    %cst_33 = arith.constant dense<0.000000e+00> : vector<9x9xf32>
    %60 = tpu.matmul %55, %57, %cst_33 {dimension_numbers = #tpu.dot_dimension_numbers<[1], [1], [0], [0], [0, 0, 1, 0], [], []>} : vector<9x8xbf16>, vector<9x8xbf16>, vector<9x9xf32> -> vector<9x9xf32>
    %61 = arith.addf %60, %5 : vector<9x9xf32>
    %cst_34 = arith.constant dense<0xFF800000> : vector<9xf32>
    %62 = vector.multi_reduction <maximumf>, %61, %cst_34 [1] : vector<9x9xf32> to vector<9xf32>
    %63 = vector.shape_cast %62 : vector<9xf32> to vector<9x1xf32>
    %64 = vector.broadcast %63 : vector<9x1xf32> to vector<9x9xf32>
    %65 = arith.subf %61, %64 : vector<9x9xf32>
    %66 = math.exp %65 : vector<9x9xf32>
    %cst_35 = arith.constant dense<0.000000e+00> : vector<9xf32>
    %67 = vector.multi_reduction <add>, %66, %cst_35 [1] : vector<9x9xf32> to vector<9xf32>
    %68 = vector.shape_cast %67 : vector<9xf32> to vector<9x1xf32>
    %69 = tpu.reciprocal %68 {approx = true} : vector<9x1xf32> -> vector<9x1xf32>
    %70 = vector.broadcast %69 : vector<9x1xf32> to vector<9x9xf32>
    %71 = arith.mulf %66, %70 : vector<9x9xf32>
    %72 = arith.truncf %71 : vector<9x9xf32> to vector<9x9xbf16>
    %cst_36 = arith.constant dense<0.000000e+00> : vector<9x8xf32>
    %73 = tpu.matmul %72, %59, %cst_36 {dimension_numbers = #tpu.dot_dimension_numbers<[1], [0], [0], [1], [0, 0, 1, 1], [], []>} : vector<9x9xbf16>, vector<9x8xbf16>, vector<9x8xf32> -> vector<9x8xf32>
    %74 = arith.truncf %73 : vector<9x8xf32> to vector<9x8xbf16>
    %c0_37 = arith.constant 0 : index
    %c0_38 = arith.constant 0 : index
    %c16_39 = arith.constant 16 : index
    %75 = vector.load %arg2[%c0_37, %c0_38, %c16_39] : memref<1x9x32xbf16, #tpu.memory_space<vmem>>, vector<1x9x8xbf16>
    %76 = vector.shape_cast %75 : vector<1x9x8xbf16> to vector<9x8xbf16>
    %77 = vector.shape_cast %74 : vector<9x8xbf16> to vector<1x9x8xbf16>
    tpu.vector_store %arg2[%c0_37, %c0_38, %c16_39], %77 {strides = array<i32>} : memref<1x9x32xbf16, #tpu.memory_space<vmem>>, vector<1x9x8xbf16>,
    %c0_40 = arith.constant 0 : index
    %c0_41 = arith.constant 0 : index
    %c24 = arith.constant 24 : index
    %78 = vector.load %arg1[%c0_40, %c0_41, %c24] : memref<1x9x96xbf16, #tpu.memory_space<vmem>>, vector<1x9x8xbf16>
    %79 = vector.shape_cast %78 : vector<1x9x8xbf16> to vector<9x8xbf16>
    %c0_42 = arith.constant 0 : index
    %c0_43 = arith.constant 0 : index
    %c56 = arith.constant 56 : index
    %80 = vector.load %arg1[%c0_42, %c0_43, %c56] : memref<1x9x96xbf16, #tpu.memory_space<vmem>>, vector<1x9x8xbf16>
    %81 = vector.shape_cast %80 : vector<1x9x8xbf16> to vector<9x8xbf16>
    %c0_44 = arith.constant 0 : index
    %c0_45 = arith.constant 0 : index
    %c88 = arith.constant 88 : index
    %82 = vector.load %arg1[%c0_44, %c0_45, %c88] : memref<1x9x96xbf16, #tpu.memory_space<vmem>>, vector<1x9x8xbf16>
    %83 = vector.shape_cast %82 : vector<1x9x8xbf16> to vector<9x8xbf16>
    %cst_46 = arith.constant dense<0.000000e+00> : vector<9x9xf32>
    %84 = tpu.matmul %79, %81, %cst_46 {dimension_numbers = #tpu.dot_dimension_numbers<[1], [1], [0], [0], [0, 0, 1, 0], [], []>} : vector<9x8xbf16>, vector<9x8xbf16>, vector<9x9xf32> -> vector<9x9xf32>
    %85 = arith.addf %84, %5 : vector<9x9xf32>
    %cst_47 = arith.constant dense<0xFF800000> : vector<9xf32>
    %86 = vector.multi_reduction <maximumf>, %85, %cst_47 [1] : vector<9x9xf32> to vector<9xf32>
    %87 = vector.shape_cast %86 : vector<9xf32> to vector<9x1xf32>
    %88 = vector.broadcast %87 : vector<9x1xf32> to vector<9x9xf32>
    %89 = arith.subf %85, %88 : vector<9x9xf32>
    %90 = math.exp %89 : vector<9x9xf32>
    %cst_48 = arith.constant dense<0.000000e+00> : vector<9xf32>
    %91 = vector.multi_reduction <add>, %90, %cst_48 [1] : vector<9x9xf32> to vector<9xf32>
    %92 = vector.shape_cast %91 : vector<9xf32> to vector<9x1xf32>
    %93 = tpu.reciprocal %92 {approx = true} : vector<9x1xf32> -> vector<9x1xf32>
    %94 = vector.broadcast %93 : vector<9x1xf32> to vector<9x9xf32>
    %95 = arith.mulf %90, %94 : vector<9x9xf32>
    %96 = arith.truncf %95 : vector<9x9xf32> to vector<9x9xbf16>
    %cst_49 = arith.constant dense<0.000000e+00> : vector<9x8xf32>
    %97 = tpu.matmul %96, %83, %cst_49 {dimension_numbers = #tpu.dot_dimension_numbers<[1], [0], [0], [1], [0, 0, 1, 1], [], []>} : vector<9x9xbf16>, vector<9x8xbf16>, vector<9x8xf32> -> vector<9x8xf32>
    %98 = arith.truncf %97 : vector<9x8xf32> to vector<9x8xbf16>
    %c0_50 = arith.constant 0 : index
    %c0_51 = arith.constant 0 : index
    %c24_52 = arith.constant 24 : index
    %99 = vector.load %arg2[%c0_50, %c0_51, %c24_52] : memref<1x9x32xbf16, #tpu.memory_space<vmem>>, vector<1x9x8xbf16>
    %100 = vector.shape_cast %99 : vector<1x9x8xbf16> to vector<9x8xbf16>
    %101 = vector.shape_cast %98 : vector<9x8xbf16> to vector<1x9x8xbf16>
    tpu.vector_store %arg2[%c0_50, %c0_51, %c24_52], %101 {strides = array<i32>} : memref<1x9x32xbf16, #tpu.memory_space<vmem>>, vector<1x9x8xbf16>,
    return
  }
  func.func @transform_0(%arg0: i32) -> (i32, i32, i32) {
    %c0_i32 = arith.constant 0 : i32
    %c0_i32_0 = arith.constant 0 : i32
    %c0_i32_1 = arith.constant 0 : i32
    return %arg0, %c0_i32, %c0_i32_0 : i32, i32, i32
  }
  func.func @transform_1(%arg0: i32) -> (i32, i32, i32) {
    %c0_i32 = arith.constant 0 : i32
    %c0_i32_0 = arith.constant 0 : i32
    %c0_i32_1 = arith.constant 0 : i32
    return %arg0, %c0_i32, %c0_i32_0 : i32, i32, i32
  }
}

module attributes {stable_mosaic.version = 11 : i64} {
  func.func @_fused_linear_kernel(%arg0: i32, %arg1: i32, %arg2: i32, %arg3: memref<24x32xbf16, #tpu.memory_space<vmem>>, %arg4: memref<32x32xbf16, #tpu.memory_space<vmem>>, %arg5: memref<1x32xf32, #tpu.memory_space<vmem>>, %arg6: memref<24x32xbf16, #tpu.memory_space<vmem>>, %arg7: memref<1x32xf32, #tpu.memory_space<vmem>>, %arg8: memref<1x32xf32, #tpu.memory_space<vmem>>, %arg9: memref<24x32xbf16, #tpu.memory_space<vmem>>) attributes {dimension_semantics = [#tpu.dimension_semantics<parallel>, #tpu.dimension_semantics<parallel>, #tpu.dimension_semantics<arbitrary>], iteration_bounds = array<i64: 1, 1, 1>, scalar_prefetch = 0 : i64, scratch_operands = 0 : i64, tpu.core_type = #tpu.core_type<tc>, window_params = [{transform_indices = @transform_0, window_bounds = array<i64: 24, 32>}, {transform_indices = @transform_1, window_bounds = array<i64: 32, 32>}, {transform_indices = @transform_2, window_bounds = array<i64: 1, 32>}, {transform_indices = @transform_3, window_bounds = array<i64: 24, 32>}, {transform_indices = @transform_4, window_bounds = array<i64: 1, 32>}, {transform_indices = @transform_5, window_bounds = array<i64: 1, 32>}, {transform_indices = @transform_6, window_bounds = array<i64: 24, 32>}]} {
    %c0 = arith.constant 0 : index
    %c0_0 = arith.constant 0 : index
    %0 = vector.load %arg3[%c0, %c0_0] : memref<24x32xbf16, #tpu.memory_space<vmem>>, vector<24x32xbf16>
    %c0_1 = arith.constant 0 : index
    %c0_2 = arith.constant 0 : index
    %1 = vector.load %arg4[%c0_1, %c0_2] : memref<32x32xbf16, #tpu.memory_space<vmem>>, vector<32x32xbf16>
    %cst = arith.constant dense<0.000000e+00> : vector<24x32xf32>
    %2 = tpu.matmul %0, %1, %cst {dimension_numbers = #tpu.dot_dimension_numbers<[1], [0], [0], [1], [0, 0, 1, 1], [], []>} : vector<24x32xbf16>, vector<32x32xbf16>, vector<24x32xf32> -> vector<24x32xf32>
    %c0_3 = arith.constant 0 : index
    %c0_4 = arith.constant 0 : index
    %3 = vector.load %arg5[%c0_3, %c0_4] : memref<1x32xf32, #tpu.memory_space<vmem>>, vector<1x32xf32>
    %4 = vector.broadcast %3 : vector<1x32xf32> to vector<24x32xf32>
    %5 = arith.addf %2, %4 : vector<24x32xf32>
    %c0_5 = arith.constant 0 : index
    %c0_6 = arith.constant 0 : index
    %6 = vector.load %arg6[%c0_5, %c0_6] : memref<24x32xbf16, #tpu.memory_space<vmem>>, vector<24x32xbf16>
    %7 = arith.extf %6 : vector<24x32xbf16> to vector<24x32xf32>
    %8 = arith.addf %7, %5 : vector<24x32xf32>
    %c0_7 = arith.constant 0 : index
    %c0_8 = arith.constant 0 : index
    %9 = vector.load %arg7[%c0_7, %c0_8] : memref<1x32xf32, #tpu.memory_space<vmem>>, vector<1x32xf32>
    %c0_9 = arith.constant 0 : index
    %c0_10 = arith.constant 0 : index
    %10 = vector.load %arg8[%c0_9, %c0_10] : memref<1x32xf32, #tpu.memory_space<vmem>>, vector<1x32xf32>
    %cst_11 = arith.constant dense<0.000000e+00> : vector<24xf32>
    %11 = vector.multi_reduction <add>, %8, %cst_11 [1] : vector<24x32xf32> to vector<24xf32>
    %12 = vector.shape_cast %11 : vector<24xf32> to vector<24x1xf32>
    %cst_12 = arith.constant 3.200000e+01 : f32
    %13 = vector.broadcast %cst_12 : f32 to vector<24x1xf32>
    %14 = arith.divf %12, %13 : vector<24x1xf32>
    %15 = vector.broadcast %14 : vector<24x1xf32> to vector<24x32xf32>
    %16 = arith.subf %8, %15 : vector<24x32xf32>
    %17 = arith.mulf %16, %16 : vector<24x32xf32>
    %cst_13 = arith.constant dense<0.000000e+00> : vector<24xf32>
    %18 = vector.multi_reduction <add>, %17, %cst_13 [1] : vector<24x32xf32> to vector<24xf32>
    %19 = vector.shape_cast %18 : vector<24xf32> to vector<24x1xf32>
    %cst_14 = arith.constant 3.200000e+01 : f32
    %20 = vector.broadcast %cst_14 : f32 to vector<24x1xf32>
    %21 = arith.divf %19, %20 : vector<24x1xf32>
    %22 = vector.broadcast %14 : vector<24x1xf32> to vector<24x32xf32>
    %23 = arith.subf %8, %22 : vector<24x32xf32>
    %cst_15 = arith.constant 9.99999974E-6 : f32
    %24 = vector.broadcast %cst_15 : f32 to vector<24x1xf32>
    %25 = arith.addf %21, %24 : vector<24x1xf32>
    %26 = math.rsqrt %25 : vector<24x1xf32>
    %27 = vector.broadcast %26 : vector<24x1xf32> to vector<24x32xf32>
    %28 = arith.mulf %23, %27 : vector<24x32xf32>
    %29 = vector.broadcast %9 : vector<1x32xf32> to vector<24x32xf32>
    %30 = arith.mulf %28, %29 : vector<24x32xf32>
    %31 = vector.broadcast %10 : vector<1x32xf32> to vector<24x32xf32>
    %32 = arith.addf %30, %31 : vector<24x32xf32>
    %33 = arith.truncf %32 : vector<24x32xf32> to vector<24x32xbf16>
    %c0_16 = arith.constant 0 : index
    %c0_17 = arith.constant 0 : index
    %34 = vector.load %arg9[%c0_16, %c0_17] : memref<24x32xbf16, #tpu.memory_space<vmem>>, vector<24x32xbf16>
    tpu.vector_store %arg9[%c0_16, %c0_17], %33 {strides = array<i32>} : memref<24x32xbf16, #tpu.memory_space<vmem>>, vector<24x32xbf16>,
    return
  }
  func.func @transform_0(%arg0: i32, %arg1: i32, %arg2: i32) -> (i32, i32) {
    %c0_i32 = arith.constant 0 : i32
    return %arg0, %arg2 : i32, i32
  }
  func.func @transform_1(%arg0: i32, %arg1: i32, %arg2: i32) -> (i32, i32) {
    %c0_i32 = arith.constant 0 : i32
    return %arg2, %arg1 : i32, i32
  }
  func.func @transform_2(%arg0: i32, %arg1: i32, %arg2: i32) -> (i32, i32) {
    %c0_i32 = arith.constant 0 : i32
    %c0_i32_0 = arith.constant 0 : i32
    return %c0_i32, %arg1 : i32, i32
  }
  func.func @transform_3(%arg0: i32, %arg1: i32, %arg2: i32) -> (i32, i32) {
    %c0_i32 = arith.constant 0 : i32
    return %arg0, %arg1 : i32, i32
  }
  func.func @transform_4(%arg0: i32, %arg1: i32, %arg2: i32) -> (i32, i32) {
    %c0_i32 = arith.constant 0 : i32
    %c0_i32_0 = arith.constant 0 : i32
    return %c0_i32, %arg1 : i32, i32
  }
  func.func @transform_5(%arg0: i32, %arg1: i32, %arg2: i32) -> (i32, i32) {
    %c0_i32 = arith.constant 0 : i32
    %c0_i32_0 = arith.constant 0 : i32
    return %c0_i32, %arg1 : i32, i32
  }
  func.func @transform_6(%arg0: i32, %arg1: i32, %arg2: i32) -> (i32, i32) {
    %c0_i32 = arith.constant 0 : i32
    return %arg0, %arg1 : i32, i32
  }
}

module attributes {stable_mosaic.version = 11 : i64} {
  func.func @_fused_linear_kernel(%arg0: i32, %arg1: i32, %arg2: i32, %arg3: memref<24x64xbf16, #tpu.memory_space<vmem>>, %arg4: memref<64x32xbf16, #tpu.memory_space<vmem>>, %arg5: memref<1x32xf32, #tpu.memory_space<vmem>>, %arg6: memref<24x32xbf16, #tpu.memory_space<vmem>>, %arg7: memref<1x32xf32, #tpu.memory_space<vmem>>, %arg8: memref<1x32xf32, #tpu.memory_space<vmem>>, %arg9: memref<24x32xbf16, #tpu.memory_space<vmem>>) attributes {dimension_semantics = [#tpu.dimension_semantics<parallel>, #tpu.dimension_semantics<parallel>, #tpu.dimension_semantics<arbitrary>], iteration_bounds = array<i64: 1, 1, 1>, scalar_prefetch = 0 : i64, scratch_operands = 0 : i64, tpu.core_type = #tpu.core_type<tc>, window_params = [{transform_indices = @transform_0, window_bounds = array<i64: 24, 64>}, {transform_indices = @transform_1, window_bounds = array<i64: 64, 32>}, {transform_indices = @transform_2, window_bounds = array<i64: 1, 32>}, {transform_indices = @transform_3, window_bounds = array<i64: 24, 32>}, {transform_indices = @transform_4, window_bounds = array<i64: 1, 32>}, {transform_indices = @transform_5, window_bounds = array<i64: 1, 32>}, {transform_indices = @transform_6, window_bounds = array<i64: 24, 32>}]} {
    %c0 = arith.constant 0 : index
    %c0_0 = arith.constant 0 : index
    %0 = vector.load %arg3[%c0, %c0_0] : memref<24x64xbf16, #tpu.memory_space<vmem>>, vector<24x64xbf16>
    %c0_1 = arith.constant 0 : index
    %c0_2 = arith.constant 0 : index
    %1 = vector.load %arg4[%c0_1, %c0_2] : memref<64x32xbf16, #tpu.memory_space<vmem>>, vector<64x32xbf16>
    %cst = arith.constant dense<0.000000e+00> : vector<24x32xf32>
    %2 = tpu.matmul %0, %1, %cst {dimension_numbers = #tpu.dot_dimension_numbers<[1], [0], [0], [1], [0, 0, 1, 1], [], []>} : vector<24x64xbf16>, vector<64x32xbf16>, vector<24x32xf32> -> vector<24x32xf32>
    %c0_3 = arith.constant 0 : index
    %c0_4 = arith.constant 0 : index
    %3 = vector.load %arg5[%c0_3, %c0_4] : memref<1x32xf32, #tpu.memory_space<vmem>>, vector<1x32xf32>
    %4 = vector.broadcast %3 : vector<1x32xf32> to vector<24x32xf32>
    %5 = arith.addf %2, %4 : vector<24x32xf32>
    %c0_5 = arith.constant 0 : index
    %c0_6 = arith.constant 0 : index
    %6 = vector.load %arg6[%c0_5, %c0_6] : memref<24x32xbf16, #tpu.memory_space<vmem>>, vector<24x32xbf16>
    %7 = arith.extf %6 : vector<24x32xbf16> to vector<24x32xf32>
    %8 = arith.addf %7, %5 : vector<24x32xf32>
    %c0_7 = arith.constant 0 : index
    %c0_8 = arith.constant 0 : index
    %9 = vector.load %arg7[%c0_7, %c0_8] : memref<1x32xf32, #tpu.memory_space<vmem>>, vector<1x32xf32>
    %c0_9 = arith.constant 0 : index
    %c0_10 = arith.constant 0 : index
    %10 = vector.load %arg8[%c0_9, %c0_10] : memref<1x32xf32, #tpu.memory_space<vmem>>, vector<1x32xf32>
    %cst_11 = arith.constant dense<0.000000e+00> : vector<24xf32>
    %11 = vector.multi_reduction <add>, %8, %cst_11 [1] : vector<24x32xf32> to vector<24xf32>
    %12 = vector.shape_cast %11 : vector<24xf32> to vector<24x1xf32>
    %cst_12 = arith.constant 3.200000e+01 : f32
    %13 = vector.broadcast %cst_12 : f32 to vector<24x1xf32>
    %14 = arith.divf %12, %13 : vector<24x1xf32>
    %15 = vector.broadcast %14 : vector<24x1xf32> to vector<24x32xf32>
    %16 = arith.subf %8, %15 : vector<24x32xf32>
    %17 = arith.mulf %16, %16 : vector<24x32xf32>
    %cst_13 = arith.constant dense<0.000000e+00> : vector<24xf32>
    %18 = vector.multi_reduction <add>, %17, %cst_13 [1] : vector<24x32xf32> to vector<24xf32>
    %19 = vector.shape_cast %18 : vector<24xf32> to vector<24x1xf32>
    %cst_14 = arith.constant 3.200000e+01 : f32
    %20 = vector.broadcast %cst_14 : f32 to vector<24x1xf32>
    %21 = arith.divf %19, %20 : vector<24x1xf32>
    %22 = vector.broadcast %14 : vector<24x1xf32> to vector<24x32xf32>
    %23 = arith.subf %8, %22 : vector<24x32xf32>
    %cst_15 = arith.constant 9.99999974E-6 : f32
    %24 = vector.broadcast %cst_15 : f32 to vector<24x1xf32>
    %25 = arith.addf %21, %24 : vector<24x1xf32>
    %26 = math.rsqrt %25 : vector<24x1xf32>
    %27 = vector.broadcast %26 : vector<24x1xf32> to vector<24x32xf32>
    %28 = arith.mulf %23, %27 : vector<24x32xf32>
    %29 = vector.broadcast %9 : vector<1x32xf32> to vector<24x32xf32>
    %30 = arith.mulf %28, %29 : vector<24x32xf32>
    %31 = vector.broadcast %10 : vector<1x32xf32> to vector<24x32xf32>
    %32 = arith.addf %30, %31 : vector<24x32xf32>
    %33 = arith.truncf %32 : vector<24x32xf32> to vector<24x32xbf16>
    %c0_16 = arith.constant 0 : index
    %c0_17 = arith.constant 0 : index
    %34 = vector.load %arg9[%c0_16, %c0_17] : memref<24x32xbf16, #tpu.memory_space<vmem>>, vector<24x32xbf16>
    tpu.vector_store %arg9[%c0_16, %c0_17], %33 {strides = array<i32>} : memref<24x32xbf16, #tpu.memory_space<vmem>>, vector<24x32xbf16>,
    return
  }
  func.func @transform_0(%arg0: i32, %arg1: i32, %arg2: i32) -> (i32, i32) {
    %c0_i32 = arith.constant 0 : i32
    return %arg0, %arg2 : i32, i32
  }
  func.func @transform_1(%arg0: i32, %arg1: i32, %arg2: i32) -> (i32, i32) {
    %c0_i32 = arith.constant 0 : i32
    return %arg2, %arg1 : i32, i32
  }
  func.func @transform_2(%arg0: i32, %arg1: i32, %arg2: i32) -> (i32, i32) {
    %c0_i32 = arith.constant 0 : i32
    %c0_i32_0 = arith.constant 0 : i32
    return %c0_i32, %arg1 : i32, i32
  }
  func.func @transform_3(%arg0: i32, %arg1: i32, %arg2: i32) -> (i32, i32) {
    %c0_i32 = arith.constant 0 : i32
    return %arg0, %arg1 : i32, i32
  }
  func.func @transform_4(%arg0: i32, %arg1: i32, %arg2: i32) -> (i32, i32) {
    %c0_i32 = arith.constant 0 : i32
    %c0_i32_0 = arith.constant 0 : i32
    return %c0_i32, %arg1 : i32, i32
  }
  func.func @transform_5(%arg0: i32, %arg1: i32, %arg2: i32) -> (i32, i32) {
    %c0_i32 = arith.constant 0 : i32
    %c0_i32_0 = arith.constant 0 : i32
    return %c0_i32, %arg1 : i32, i32
  }
  func.func @transform_6(%arg0: i32, %arg1: i32, %arg2: i32) -> (i32, i32) {
    %c0_i32 = arith.constant 0 : i32
    return %arg0, %arg1 : i32, i32
  }
}

module attributes {stable_mosaic.version = 11 : i64} {
  func.func @_fused_linear_kernel(%arg0: i32, %arg1: i32, %arg2: i32, %arg3: memref<24x32xbf16, #tpu.memory_space<vmem>>, %arg4: memref<32x64xbf16, #tpu.memory_space<vmem>>, %arg5: memref<1x64xf32, #tpu.memory_space<vmem>>, %arg6: memref<24x64xbf16, #tpu.memory_space<vmem>>) attributes {dimension_semantics = [#tpu.dimension_semantics<parallel>, #tpu.dimension_semantics<parallel>, #tpu.dimension_semantics<arbitrary>], iteration_bounds = array<i64: 1, 1, 1>, scalar_prefetch = 0 : i64, scratch_operands = 0 : i64, tpu.core_type = #tpu.core_type<tc>, window_params = [{transform_indices = @transform_0, window_bounds = array<i64: 24, 32>}, {transform_indices = @transform_1, window_bounds = array<i64: 32, 64>}, {transform_indices = @transform_2, window_bounds = array<i64: 1, 64>}, {transform_indices = @transform_3, window_bounds = array<i64: 24, 64>}]} {
    %c0 = arith.constant 0 : index
    %c0_0 = arith.constant 0 : index
    %0 = vector.load %arg3[%c0, %c0_0] : memref<24x32xbf16, #tpu.memory_space<vmem>>, vector<24x32xbf16>
    %c0_1 = arith.constant 0 : index
    %c0_2 = arith.constant 0 : index
    %1 = vector.load %arg4[%c0_1, %c0_2] : memref<32x64xbf16, #tpu.memory_space<vmem>>, vector<32x64xbf16>
    %cst = arith.constant dense<0.000000e+00> : vector<24x64xf32>
    %2 = tpu.matmul %0, %1, %cst {dimension_numbers = #tpu.dot_dimension_numbers<[1], [0], [0], [1], [0, 0, 1, 1], [], []>} : vector<24x32xbf16>, vector<32x64xbf16>, vector<24x64xf32> -> vector<24x64xf32>
    %c0_3 = arith.constant 0 : index
    %c0_4 = arith.constant 0 : index
    %3 = vector.load %arg5[%c0_3, %c0_4] : memref<1x64xf32, #tpu.memory_space<vmem>>, vector<1x64xf32>
    %4 = vector.broadcast %3 : vector<1x64xf32> to vector<24x64xf32>
    %5 = arith.addf %2, %4 : vector<24x64xf32>
    %cst_5 = arith.constant 5.000000e-01 : f32
    %6 = vector.broadcast %cst_5 : f32 to vector<24x64xf32>
    %7 = arith.mulf %6, %5 : vector<24x64xf32>
    %cst_6 = arith.constant 0.707106769 : f32
    %8 = vector.broadcast %cst_6 : f32 to vector<24x64xf32>
    %9 = arith.mulf %5, %8 : vector<24x64xf32>
    %10 = math.erf %9 : vector<24x64xf32>
    %cst_7 = arith.constant 1.000000e+00 : f32
    %11 = vector.broadcast %cst_7 : f32 to vector<24x64xf32>
    %12 = arith.addf %11, %10 : vector<24x64xf32>
    %13 = arith.mulf %7, %12 : vector<24x64xf32>
    %14 = arith.truncf %13 : vector<24x64xf32> to vector<24x64xbf16>
    %c0_8 = arith.constant 0 : index
    %c0_9 = arith.constant 0 : index
    %15 = vector.load %arg6[%c0_8, %c0_9] : memref<24x64xbf16, #tpu.memory_space<vmem>>, vector<24x64xbf16>
    tpu.vector_store %arg6[%c0_8, %c0_9], %14 {strides = array<i32>} : memref<24x64xbf16, #tpu.memory_space<vmem>>, vector<24x64xbf16>,
    return
  }
  func.func @transform_0(%arg0: i32, %arg1: i32, %arg2: i32) -> (i32, i32) {
    %c0_i32 = arith.constant 0 : i32
    return %arg0, %arg2 : i32, i32
  }
  func.func @transform_1(%arg0: i32, %arg1: i32, %arg2: i32) -> (i32, i32) {
    %c0_i32 = arith.constant 0 : i32
    return %arg2, %arg1 : i32, i32
  }
  func.func @transform_2(%arg0: i32, %arg1: i32, %arg2: i32) -> (i32, i32) {
    %c0_i32 = arith.constant 0 : i32
    %c0_i32_0 = arith.constant 0 : i32
    return %c0_i32, %arg1 : i32, i32
  }
  func.func @transform_3(%arg0: i32, %arg1: i32, %arg2: i32) -> (i32, i32) {
    %c0_i32 = arith.constant 0 : i32
    return %arg0, %arg1 : i32, i32
  }
}

module attributes {stable_mosaic.version = 11 : i64} {
  func.func @_fused_linear_kernel(%arg0: i32, %arg1: i32, %arg2: i32, %arg3: memref<16x32xbf16, #tpu.memory_space<vmem>>, %arg4: memref<32x32xbf16, #tpu.memory_space<vmem>>, %arg5: memref<1x32xf32, #tpu.memory_space<vmem>>, %arg6: memref<1x32xf32, #tpu.memory_space<vmem>>, %arg7: memref<1x32xf32, #tpu.memory_space<vmem>>, %arg8: memref<16x32xbf16, #tpu.memory_space<vmem>>) attributes {dimension_semantics = [#tpu.dimension_semantics<parallel>, #tpu.dimension_semantics<parallel>, #tpu.dimension_semantics<arbitrary>], iteration_bounds = array<i64: 1, 1, 1>, scalar_prefetch = 0 : i64, scratch_operands = 0 : i64, tpu.core_type = #tpu.core_type<tc>, window_params = [{transform_indices = @transform_0, window_bounds = array<i64: 16, 32>}, {transform_indices = @transform_1, window_bounds = array<i64: 32, 32>}, {transform_indices = @transform_2, window_bounds = array<i64: 1, 32>}, {transform_indices = @transform_3, window_bounds = array<i64: 1, 32>}, {transform_indices = @transform_4, window_bounds = array<i64: 1, 32>}, {transform_indices = @transform_5, window_bounds = array<i64: 16, 32>}]} {
    %c0 = arith.constant 0 : index
    %c0_0 = arith.constant 0 : index
    %0 = vector.load %arg3[%c0, %c0_0] : memref<16x32xbf16, #tpu.memory_space<vmem>>, vector<16x32xbf16>
    %c0_1 = arith.constant 0 : index
    %c0_2 = arith.constant 0 : index
    %1 = vector.load %arg4[%c0_1, %c0_2] : memref<32x32xbf16, #tpu.memory_space<vmem>>, vector<32x32xbf16>
    %cst = arith.constant dense<0.000000e+00> : vector<16x32xf32>
    %2 = tpu.matmul %0, %1, %cst {dimension_numbers = #tpu.dot_dimension_numbers<[1], [0], [0], [1], [0, 0, 1, 1], [], []>} : vector<16x32xbf16>, vector<32x32xbf16>, vector<16x32xf32> -> vector<16x32xf32>
    %c0_3 = arith.constant 0 : index
    %c0_4 = arith.constant 0 : index
    %3 = vector.load %arg5[%c0_3, %c0_4] : memref<1x32xf32, #tpu.memory_space<vmem>>, vector<1x32xf32>
    %4 = vector.broadcast %3 : vector<1x32xf32> to vector<16x32xf32>
    %5 = arith.addf %2, %4 : vector<16x32xf32>
    %cst_5 = arith.constant 5.000000e-01 : f32
    %6 = vector.broadcast %cst_5 : f32 to vector<16x32xf32>
    %7 = arith.mulf %6, %5 : vector<16x32xf32>
    %cst_6 = arith.constant 0.707106769 : f32
    %8 = vector.broadcast %cst_6 : f32 to vector<16x32xf32>
    %9 = arith.mulf %5, %8 : vector<16x32xf32>
    %10 = math.erf %9 : vector<16x32xf32>
    %cst_7 = arith.constant 1.000000e+00 : f32
    %11 = vector.broadcast %cst_7 : f32 to vector<16x32xf32>
    %12 = arith.addf %11, %10 : vector<16x32xf32>
    %13 = arith.mulf %7, %12 : vector<16x32xf32>
    %c0_8 = arith.constant 0 : index
    %c0_9 = arith.constant 0 : index
    %14 = vector.load %arg6[%c0_8, %c0_9] : memref<1x32xf32, #tpu.memory_space<vmem>>, vector<1x32xf32>
    %c0_10 = arith.constant 0 : index
    %c0_11 = arith.constant 0 : index
    %15 = vector.load %arg7[%c0_10, %c0_11] : memref<1x32xf32, #tpu.memory_space<vmem>>, vector<1x32xf32>
    %cst_12 = arith.constant dense<0.000000e+00> : vector<16xf32>
    %16 = vector.multi_reduction <add>, %13, %cst_12 [1] : vector<16x32xf32> to vector<16xf32>
    %17 = vector.shape_cast %16 : vector<16xf32> to vector<16x1xf32>
    %cst_13 = arith.constant 3.200000e+01 : f32
    %18 = vector.broadcast %cst_13 : f32 to vector<16x1xf32>
    %19 = arith.divf %17, %18 : vector<16x1xf32>
    %20 = vector.broadcast %19 : vector<16x1xf32> to vector<16x32xf32>
    %21 = arith.subf %13, %20 : vector<16x32xf32>
    %22 = arith.mulf %21, %21 : vector<16x32xf32>
    %cst_14 = arith.constant dense<0.000000e+00> : vector<16xf32>
    %23 = vector.multi_reduction <add>, %22, %cst_14 [1] : vector<16x32xf32> to vector<16xf32>
    %24 = vector.shape_cast %23 : vector<16xf32> to vector<16x1xf32>
    %cst_15 = arith.constant 3.200000e+01 : f32
    %25 = vector.broadcast %cst_15 : f32 to vector<16x1xf32>
    %26 = arith.divf %24, %25 : vector<16x1xf32>
    %27 = vector.broadcast %19 : vector<16x1xf32> to vector<16x32xf32>
    %28 = arith.subf %13, %27 : vector<16x32xf32>
    %cst_16 = arith.constant 9.99999996E-13 : f32
    %29 = vector.broadcast %cst_16 : f32 to vector<16x1xf32>
    %30 = arith.addf %26, %29 : vector<16x1xf32>
    %31 = math.rsqrt %30 : vector<16x1xf32>
    %32 = vector.broadcast %31 : vector<16x1xf32> to vector<16x32xf32>
    %33 = arith.mulf %28, %32 : vector<16x32xf32>
    %34 = vector.broadcast %14 : vector<1x32xf32> to vector<16x32xf32>
    %35 = arith.mulf %33, %34 : vector<16x32xf32>
    %36 = vector.broadcast %15 : vector<1x32xf32> to vector<16x32xf32>
    %37 = arith.addf %35, %36 : vector<16x32xf32>
    %38 = arith.truncf %37 : vector<16x32xf32> to vector<16x32xbf16>
    %c0_17 = arith.constant 0 : index
    %c0_18 = arith.constant 0 : index
    %39 = vector.load %arg8[%c0_17, %c0_18] : memref<16x32xbf16, #tpu.memory_space<vmem>>, vector<16x32xbf16>
    tpu.vector_store %arg8[%c0_17, %c0_18], %38 {strides = array<i32>} : memref<16x32xbf16, #tpu.memory_space<vmem>>, vector<16x32xbf16>,
    return
  }
  func.func @transform_0(%arg0: i32, %arg1: i32, %arg2: i32) -> (i32, i32) {
    %c0_i32 = arith.constant 0 : i32
    return %arg0, %arg2 : i32, i32
  }
  func.func @transform_1(%arg0: i32, %arg1: i32, %arg2: i32) -> (i32, i32) {
    %c0_i32 = arith.constant 0 : i32
    return %arg2, %arg1 : i32, i32
  }
  func.func @transform_2(%arg0: i32, %arg1: i32, %arg2: i32) -> (i32, i32) {
    %c0_i32 = arith.constant 0 : i32
    %c0_i32_0 = arith.constant 0 : i32
    return %c0_i32, %arg1 : i32, i32
  }
  func.func @transform_3(%arg0: i32, %arg1: i32, %arg2: i32) -> (i32, i32) {
    %c0_i32 = arith.constant 0 : i32
    %c0_i32_0 = arith.constant 0 : i32
    return %c0_i32, %arg1 : i32, i32
  }
  func.func @transform_4(%arg0: i32, %arg1: i32, %arg2: i32) -> (i32, i32) {
    %c0_i32 = arith.constant 0 : i32
    %c0_i32_0 = arith.constant 0 : i32
    return %c0_i32, %arg1 : i32, i32
  }
  func.func @transform_5(%arg0: i32, %arg1: i32, %arg2: i32) -> (i32, i32) {
    %c0_i32 = arith.constant 0 : i32
    return %arg0, %arg1 : i32, i32
  }
}

module attributes {stable_mosaic.version = 11 : i64} {
  func.func @_fused_linear_kernel(%arg0: i32, %arg1: i32, %arg2: i32, %arg3: memref<16x32xbf16, #tpu.memory_space<vmem>>, %arg4: memref<32x128xbf16, #tpu.memory_space<vmem>>, %arg5: memref<1x128xf32, #tpu.memory_space<vmem>>, %arg6: memref<16x128xf32, #tpu.memory_space<vmem>>) attributes {dimension_semantics = [#tpu.dimension_semantics<parallel>, #tpu.dimension_semantics<parallel>, #tpu.dimension_semantics<arbitrary>], iteration_bounds = array<i64: 1, 1, 1>, scalar_prefetch = 0 : i64, scratch_operands = 0 : i64, tpu.core_type = #tpu.core_type<tc>, window_params = [{transform_indices = @transform_0, window_bounds = array<i64: 16, 32>}, {transform_indices = @transform_1, window_bounds = array<i64: 32, 128>}, {transform_indices = @transform_2, window_bounds = array<i64: 1, 128>}, {transform_indices = @transform_3, window_bounds = array<i64: 16, 128>}]} {
    %c0 = arith.constant 0 : index
    %c0_0 = arith.constant 0 : index
    %0 = vector.load %arg3[%c0, %c0_0] : memref<16x32xbf16, #tpu.memory_space<vmem>>, vector<16x32xbf16>
    %c0_1 = arith.constant 0 : index
    %c0_2 = arith.constant 0 : index
    %1 = vector.load %arg4[%c0_1, %c0_2] : memref<32x128xbf16, #tpu.memory_space<vmem>>, vector<32x128xbf16>
    %cst = arith.constant dense<0.000000e+00> : vector<16x128xf32>
    %2 = tpu.matmul %0, %1, %cst {dimension_numbers = #tpu.dot_dimension_numbers<[1], [0], [0], [1], [0, 0, 1, 1], [], []>} : vector<16x32xbf16>, vector<32x128xbf16>, vector<16x128xf32> -> vector<16x128xf32>
    %c0_3 = arith.constant 0 : index
    %c0_4 = arith.constant 0 : index
    %3 = vector.load %arg5[%c0_3, %c0_4] : memref<1x128xf32, #tpu.memory_space<vmem>>, vector<1x128xf32>
    %4 = vector.broadcast %3 : vector<1x128xf32> to vector<16x128xf32>
    %5 = arith.addf %2, %4 : vector<16x128xf32>
    %c0_5 = arith.constant 0 : index
    %c0_6 = arith.constant 0 : index
    %6 = vector.load %arg6[%c0_5, %c0_6] : memref<16x128xf32, #tpu.memory_space<vmem>>, vector<16x128xf32>
    tpu.vector_store %arg6[%c0_5, %c0_6], %5 {strides = array<i32>} : memref<16x128xf32, #tpu.memory_space<vmem>>, vector<16x128xf32>,
    return
  }
  func.func @transform_0(%arg0: i32, %arg1: i32, %arg2: i32) -> (i32, i32) {
    %c0_i32 = arith.constant 0 : i32
    return %arg0, %arg2 : i32, i32
  }
  func.func @transform_1(%arg0: i32, %arg1: i32, %arg2: i32) -> (i32, i32) {
    %c0_i32 = arith.constant 0 : i32
    return %arg2, %arg1 : i32, i32
  }
  func.func @transform_2(%arg0: i32, %arg1: i32, %arg2: i32) -> (i32, i32) {
    %c0_i32 = arith.constant 0 : i32
    %c0_i32_0 = arith.constant 0 : i32
    return %c0_i32, %arg1 : i32, i32
  }
  func.func @transform_3(%arg0: i32, %arg1: i32, %arg2: i32) -> (i32, i32) {
    %c0_i32 = arith.constant 0 : i32
    return %arg0, %arg1 : i32, i32
  }
}

</mosaic_0001>

<bundles_post_ra>
// kernel: trans_forward.16
= control target key start
LH: loop header
LB: loop body
LE: loop exit
PB: predicated region body
PF: predicated region fallthrough
CT: control target
= control target key end

     0   :  { %vm49_vm0 = vcmask 261120   ;;  %vm117_vm1 = vcmask 781312   ;;  %s198_s1 = inlined_call_operand.vmem [shape: bf16[32,96], index: 1, kind: input, shape index: {}]   ;;  %s199_s0 = inlined_call_operand.vmem [shape: bf16[24,32], index: 0, kind: input, shape index: {}]   ;;  %s200_s2 = inlined_call_operand.vmem [shape: f32[1,96], index: 2, kind: input, shape index: {}]   ;;  %s201_s3 = inlined_call_operand.vmem [shape: bf16[24,96], index: 3, kind: output, shape index: {}]  }
   0x1   :  { %v150_v0 = vld [vmem:[%s198_s1 + $0x8] sm:$0xff]   ;;  %v151_v1 = vld [vmem:[%s198_s1] sm:$0xff]  }
   0x2   :  { %142 = vmatprep.subr.bf16.mxu0 %v150_v0  ;;  %v152_v2 = vld [vmem:[%s199_s0] sm:$0xff]   ;;  %v153_v3 = vld [vmem:[%s199_s0 + $0x8] ss:$0 sps:$4 sm:$0xff]  }
   0x3   :  { %143 = vmatpush3.bf16.msra.mxu0 %v150_v0  ;;  %146 = vmatprep.mubr.msk.bf16.mxu0 %vm49_vm0, %v152_v2  ;;  %v125_v4 = vld [vmem:[%s200_s2] ss:$0 sm:$0xff] }
   0x4   :  { %144 = vmatprep.subr.bf16.mxu0 %v151_v1 }
   0x7   :  { %145 = vmatpush3.bf16.msra.mxu0 %v151_v1 }
   0xa   :  { %147 = vmatmul.mubr.msk.bf16.vlgmr.msra.gmra.mxu0 %vm49_vm0, %v153_v3 }
  0xca   :  { %v148_v5 = vpop.f32.mrf.mxu0 }
  0xcb   :  { %v99_v6 = vadd.f32 %v148_v5, %v125_v4 }
  0xcc   :  { %v90_v7 = vpop.f32.mrf.mxu0 }
  0xcd   :  { %v137_v8 = vpack.c.bf16 %v99_v6, %v99_v6  ;;  %v91_v9 = vadd.f32 %v125_v4, %v90_v7 }
  0xce   :  { %v149_v10 = vpop.f32.mrf.mxu0 }
  0xcf   :  { %120 = vst.msk [vmem:[%s201_s3 + $0x8] sm:$0xf] %vm117_vm1, %v137_v8  ;;  %v135_v11 = vpack.c.bf16 %v91_v9, %v91_v9 }
  0xd0   :  { %v93_v12 = vpop.f32.mrf.mxu0 }
  0xd1   :  { %118 = vst.msk [vmem:[%s201_s3] sm:$0xf] %vm117_vm1, %v135_v11  ;;  %v94_v13 = vadd.f32 %v125_v4, %v93_v12 }
  0xd3   :  { %v136_v14 = vpack.c.bf16 %v94_v13, %v94_v13 }
  0xd5   :  { %119 = vst.msk [vmem:[%s201_s3 + $0x4] sm:$0xf] %vm117_vm1, %v136_v14 }

// kernel: trans_forward.15
= control target key start
LH: loop header
LB: loop body
LE: loop exit
PB: predicated region body
PF: predicated region fallthrough
CT: control target
= control target key end

     0   :  { %v109_v0 = vmov 0.0   ;;  %vm110_vm0 = vmmov 0   ;;  %vm39_vm1 = vcmask 261120   ;;  %vm84_vm2 = vcmask 257024   ;;  %s146_s1 = inlined_call_operand.vmem [shape: bf16[32,32], index: 1, kind: input, shape index: {}]   ;;  %s147_s0 = inlined_call_operand.vmem [shape: bf16[8,32], index: 0, kind: input, shape index: {}]   ;;  %s148_s2 = inlined_call_operand.vmem [shape: f32[1,32], index: 2, kind: input, shape index: {}]   ;;  %s149_s3 = inlined_call_operand.vmem [shape: bf16[8,32], index: 3, kind: output, shape index: {}]  }
   0x1   :  { %97 = vmatprep.subr.bf16.mxu0 %v109_v0  ;;  %v107_v1 = vld [vmem:[%s146_s1 + $0x8] sm:$0xff]   ;;  %101 = vmatprep.mubr.msk.bf16.mxu0 %vm110_vm0, %v109_v0  ;;  %v108_v2 = vld [vmem:[%s146_s1] sm:$0xff]  }
   0x2   :  { %98 = vmatpush3.bf16.msra.mxu0 %v107_v1  ;;  %v15_v3 = vld [vmem:[%s147_s0] sm:$0xf] }
   0x3   :  { %99 = vmatprep.subr.bf16.mxu0 %v109_v0  ;;  %v90_v4 = vld [vmem:[%s148_s2] ss:$0 sm:$0xff] }
   0x6   :  { %100 = vmatpush3.bf16.msra.mxu0 %v108_v2 }
   0x9   :  { %102 = vmatmul.mubr.msk.bf16.vlgmr.msra.gmra.mxu0 %vm39_vm1, %v15_v3 }
  0xc9   :  { %v77_v5 = vpop.f32.mrf.mxu0 }
  0xca   :  { %v78_v6 = vadd.f32 %v90_v4, %v77_v5 }
  0xcb   :  { %v103_v7 = vpop.f32.mrf.mxu0 }
  0xcc   :  { %v83_v8 = vpack.c.bf16 %v78_v6, %v78_v6 }
  0xcd   :  { %v80_v9 = vpop.f32.mrf.mxu0 }
  0xce   :  { %85 = vst.msk [vmem:[%s149_s3] sm:$0xf] %vm84_vm2, %v83_v8 }
  0xcf   :  { %v104_v10 = vpop.f32.mrf.mxu0 }

// kernel: trans_forward.14
= control target key start
LH: loop header
LB: loop body
LE: loop exit
PB: predicated region body
PF: predicated region fallthrough
CT: control target
= control target key end

     0   :  { %s378_s15 = smov 0   ;;  %s404_s0 = inlined_call_operand.vmem [shape: bf16[2,8,16], index: 0, kind: input, shape index: {}]   ;;  %s405_s1 = inlined_call_operand.vmem [shape: bf16[16,32], index: 1, kind: input, shape index: {}]   ;;  %s406_s2 = inlined_call_operand.vmem [shape: f32[1,32], index: 2, kind: input, shape index: {}]   ;;  %s407_s3 = inlined_call_operand.vmem [shape: f32[8,32], index: 3, kind: input, shape index: {}]   ;;  %s408_s4 = inlined_call_operand.vmem [shape: bf16[2,8,32], index: 4, kind: output, shape index: {}]  }
   0x1 LB: > { %s312_s16 = sadd.s32 4294967295, %s349_s15   ;;  %p316_p0 = scmp.ge.s32.totalorder %s349_s15, 1  ;;  %s349_s15 = sphi %s378_s15, %s14_s15  }
   0x2   : > { %p161_p1 = scmp.lt.s32.totalorder %s349_s15, 3 }
   0x4   : > { %p162_p2 = pnand %p316_p0, %p161_p1 }
   0x5   : > { %p185_p3 = scmp.lt.s32.totalorder (!%p162_p2), %s312_s16, 1 }
   0x6   : > { %165 = sbr.rel (%p162_p2) target bundleno = 216 (0xd8), region = 36 }
   0xb   : > { %v342_v0 = vld [vmem:[%s405_s1] sm:$0xff]   ;;  %v351_v1 = vmov 0.0   ;;  %vm352_vm0 = vmmov 0   ;;  %s410_s16 = smov (!%p185_p3, %s312_s16), 1  ;;  %vm210_vm1 = vcmask 130048   ;;  %vm257_vm2 = vcmask 257024  }
   0xc   : > { %326 = vmatprep.subr.bf16.mxu0 %v351_v1  ;;  %328 = vmatprep.mubr.msk.bf16.mxu0 %vm352_vm0, %v351_v1  ;;  %s317_s19 = sshll.u32 %s410_s16, 2  ;;  %v319_v3 = vld [vmem:[%s406_s2] ss:$0 sm:$0xff] }
   0xd   : > { %327 = vmatpush3.bf16.msra.mxu0 %v342_v0  ;;  %s188_s22 = scalar_lea.vmem %s404_s0, %s317_s19  ;;  %v254_v5 = vld [vmem:[%s407_s3] sm:$0xff]  ;;  %s192_s29 = scalar_lea.vmem %s408_s4, %s317_s19 }
   0xe   : > { %v194_v2 = vld [vmem:[%s188_s22] sm:$0xf] }
  0x10   : > { %329 = vmatmul.mubr.msk.bf16.vlgmr.msra.gmra.mxu0 %vm210_vm1, %v194_v2 }
  0xd0   : > { %v248_v4 = vpop.f32.mrf.mxu0 }
  0xd1   : > { %v249_v6 = vadd.f32 %v319_v3, %v248_v4 }
  0xd2   : > { %v330_v7 = vpop.f32.mrf.mxu0 }
  0xd3   : > { %v255_v8 = vadd.f32 %v254_v5, %v249_v6 }
  0xd4   : > { %v251_v9 = vpop.f32.mrf.mxu0 }
  0xd5   : > { %v256_v10 = vpack.c.bf16 %v255_v8, %v255_v8 }
  0xd6   : > { %v331_v11 = vpop.f32.mrf.mxu0 }
  0xd7   : > { %258 = vst.msk [vmem:[%s192_s29] sm:$0xf] %vm257_vm2, %v256_v10 }
  0xd8 PF: > { %s14_s15 = sadd.s32 1, %s349_s15  }
  0xd9   : > { %p11_p4 = scmp.ge.s32.totalorder %s14_s15, 4  }
  0xdb   :  { %13 = sbr.rel (!%p11_p4) target bundleno = 1 (0x1), region = 66 }

// kernel: trans_forward.17
= control target key start
LH: loop header
LB: loop body
LE: loop exit
PB: predicated region body
PF: predicated region fallthrough
CT: control target
= control target key end

     0   :  { %s981_s6 = smov 0   ;;  %s1116_s0 = inlined_call_operand.vmem [shape: bf16[2,9,96], index: 0, kind: input, shape index: {}]   ;;  %s1117_s1 = inlined_call_operand.vmem [shape: bf16[2,9,32], index: 1, kind: output, shape index: {}]  }
   0x1 LB: > { %s780_s7 = sadd.s32 4294967295, %s952_s6   ;;  %p784_p0 = scmp.ge.s32.totalorder %s952_s6, 1  ;;  %s952_s6 = sphi %s981_s6, %s11_s6  }
   0x2   : > { %p87_p1 = scmp.lt.s32.totalorder %s952_s6, 3 }
   0x4   : > { %p88_p2 = pnand %p784_p0, %p87_p1 }
   0x5   : > { %p107_p3 = scmp.lt.s32.totalorder (!%p88_p2), %s780_s7, 1  ;;  %s956_s12 = smov (!%p88_p2), 96  }
   0x6   : > { %91 = sbr.rel (%p88_p2) target bundleno = 1506 (0x5e2), region = 24  ;;  %s957_s13 = smov (!%p88_p2), 64  }
   0x7   : > { %s958_s14 = smov (!%p88_p2), 80   ;;  %s960_s15 = smov (!%p88_p2), 88  }
   0x8   : > { %s961_s16 = smov (!%p88_p2), 120   ;;  %s962_s17 = smov (!%p88_p2), 112  }
   0x9   : > { %s963_s18 = smov (!%p88_p2), 72   ;;  %s964_s19 = smov (!%p88_p2), 104  }
   0xa   : > { %s965_s23 = smov (!%p88_p2), 56   ;;  %s966_s24 = smov (!%p88_p2), 40  }
   0xb   : > { %v954_v0 = vmov 0.0   ;;  %vm955_vm0 = vmmov 0   ;;  %s1119_s7 = smov (!%p107_p3, %s780_s7), 1  ;;  %vm136_vm1 = vcmask 64512   ;;  %v118_v4 = vlaneseq  ;;  %s967_s25 = smov 48  }
   0xc   : > { %837 = vmatprep.subr.bf16.mxu0 %v954_v0  ;;  %839 = vmatprep.mubr.msk.bf16.mxu0 %vm955_vm0, %v954_v0  ;;  %s811_s8 = sshll.u32 %s1119_s7, 3  ;;  %vm184_vm4 = vcmask 72704   ;;  %vm188_vm5 = vcmask 65536   ;;  %vm214_vm6 = vcmask 1043456   ;;  %vm215_vm7 = vcmask 1044480   ;;  %s968_s26 = smov 8  }
   0xd   : > { %843 = vmatprep.subr.bf16.mxu1 %v954_v0  ;;  %845 = vmatprep.mubr.msk.bf16.mxu1 %vm955_vm0, %v954_v0  ;;  %s1003_s11 = scalar_lea.vmem %s1116_s0, %s811_s8  ;;  %v119_v5 = vshrl.u32 %v118_v4, 7  ;;  %v122_v6 = vand.u32 127, %v118_v4  ;;  %v959_v22 = vmov 65535   ;;  %s1062_s22 = scalar_lea.vmem %s1117_s1, %s811_s8  ;;  %vm270_vm8 = vcmask 60416  }
   0xe   : > { %v910_v1 = vld [vmem:[%s1003_s11] sm:$0x1f]   ;;  %v216_v23 = vsel %vm214_vm6, 4294967295, %v959_v22  ;;  %vm272_vm9 = vcmask 57344   ;;  %vm273_vm10 = vsmask.f32 256 }
   0xf   : > { %134 = vrot.lane.b32.xlu0 %v910_v1, %s956_s12  ;;  %vm123_vm2 = vcmp.le.s32.totalorder %v122_v6, %v119_v5  ;;  %v120_v7 = vadd.s32 8, %v119_v5  ;;  %v1022_v18 = vld [vmem:[%s1003_s11] sm:$0x1f]   ;;  %v1025_v26 = vsel %vm215_vm7, %v216_v23, 0  ;;  %vm274_vm11 = vmand %vm272_vm9, %vm273_vm10  ;;  %s969_s27 = smov 16   ;;  %s970_s28 = smov 24  }
  0x10   : > { %v1012_v8 = vsel %vm123_vm2, 1.0, %v954_v0  ;;  %v1032_v34 = vld [vmem:[%s1003_s11] sm:$0x1f]   ;;  %vm422_vm12 = vcmask 122944   ;;  %vm420_vm14 = vcmask 126016   ;;  %vm571_vm15 = vcmask 188544  }
  0x11   : > { %vm124_vm3 = vcmp.le.s32.totalorder %v122_v6, %v120_v7  ;;  %v1038_v35 = vld [vmem:[%s1003_s11] sm:$0x1f]   ;;  %vm423_vm13 = vmand %vm422_vm12, %vm273_vm10  ;;  %vm720_vm2 = vcmask 254144  }
  0x12   : > { %v1016_v12 = vsel %vm124_vm3, 1.0, %v954_v0  ;;  %v275_v56 = vld [vmem:[%s1062_s22 + $0x4] sm:$0x1]  ;;  %vm718_vm3 = vcmask 257216  }
  0x81   : > { %v135_v2 = vpop.permute.xlu0 %134 }
  0x82   : > { %v141_v3 = vsel %vm136_vm1, %v135_v2, 0 }
  0x83   : > { %838 = vmatpush3.bf16.xpose.msra.mxu0 %v141_v3 }
  0x84   : > { %855 = vmatprep.subr.bf16.mxu0 %v954_v0 }
  0x8a   : > { %840 = vmatmul.mubr.msk.bf16.vlgmr.msra.gmra.mxu0 %vm136_vm1, %v910_v1 }
  0x8b   : > { %857 = vmatprep.mubr.msk.bf16.mxu0 %vm955_vm0, %v954_v0 }
 0x14a   : > { %v177_v9 = vpop.f32.mrf.mxu0 }
 0x14b   : > { %v178_v10 = vadd.f32 %v177_v9, %v1012_v8 }
 0x14c   : > { %v841_v11 = vpop.f32.mrf.mxu0 }
 0x14d   : > { %v185_v13 = vsel %vm184_vm4, %v178_v10, -inf }
 0x14e   : > { %186 = vmax.xlane.f32.xlu0 %v185_v13  ;;  %v180_v14 = vpop.f32.mrf.mxu0 }
 0x14f   : > { %v181_v15 = vadd.f32 %v180_v14, %v1016_v12 }
 0x150   : > { %v842_v16 = vpop.f32.mrf.mxu0 }
 0x151   : > { %v189_v17 = vsel %vm188_vm5, %v181_v15, -inf }
 0x152   : > { %190 = vmax.xlane.f32.xlu1 %v189_v17 }
 0x163   : > { %209 = vrot.lane.b32.xlu1 %v910_v1, %s957_s13 }
 0x164   : > { %436 = vrot.lane.b32.xlu0 %v1022_v18, %s958_s14 }
 0x1d7   : > { %v187_v19 = vpop.xlane.xlu0 %186 }
 0x1d8   : > { %v192_v20 = vsub.f32 %v178_v10, %v187_v19 }
 0x1da   : > { %v194_v21 = vmul.f32 1.442695, %v192_v20 }
 0x1db   : > { %v191_v24 = vpop.xlane.xlu1 %190  ;;  %v437_v46 = vpop.permute.xlu0 %436 }
 0x1dc   : > { %914 = vpow2.f32 %v194_v21  ;;  %v193_v25 = vsub.f32 %v181_v15, %v191_v24  ;;  %v442_v48 = vsel %vm136_vm1, %v437_v46, 0 }
 0x1de   : > { %v196_v27 = vmul.f32 1.442695, %v193_v25 }
 0x1df   : > { %v210_v28 = vpop.permute.xlu1 %209 }
 0x1e0   : > { %916 = vpow2.f32 %v196_v27  ;;  %v219_v29 = vand.u32 %v1025_v26, %v210_v28 }
 0x1e2   : > { %844 = vmatpush3.bf16.msra.mxu1 %v219_v29 }
 0x1e3   : > { %849 = vmatprep.subr.bf16.mxu1 %v954_v0 }
 0x1e9   : > { %v915_v30 = vpop.eup %914 }
 0x1ea   : > { %v198_v31 = vsel %vm184_vm4, %v915_v30, 0.0 }
 0x1eb   : > { %199 = vadd.xlane.f32.xlu1 %v198_v31 }
 0x1ed   : > { %v917_v32 = vpop.eup %916 }
 0x1ee   : > { %v201_v33 = vsel %vm188_vm5, %v917_v32, 0.0 }
 0x1ef   : > { %202 = vadd.xlane.f32.xlu1 %v201_v33 }
 0x200   : > { %287 = vrot.lane.b32.xlu1 %v1032_v34, %s960_s15 }
 0x204   : > { %285 = vrot.lane.b32.xlu1 %v1032_v34, %s961_s16 }
 0x208   : > { %434 = vrot.lane.b32.xlu1 %v1022_v18, %s962_s17 }
 0x20c   : > { %585 = vrot.lane.b32.xlu1 %v1038_v35, %s963_s18 }
 0x210   : > { %583 = vrot.lane.b32.xlu1 %v1038_v35, %s964_s19 }
 0x274   : > { %v200_v36 = vpop.xlane.xlu1 %199 }
 0x275   : > { %918 = vrcp.f32 %v200_v36 }
 0x278   : > { %v203_v37 = vpop.xlane.xlu1 %202 }
 0x279   : > { %920 = vrcp.f32 %v203_v37 }
 0x27c   : > { %v288_v40 = vpop.permute.xlu1 %287 }
 0x27d   : > { %v293_v43 = vsel %vm136_vm1, %v288_v40, 0 }
 0x280   : > { %v286_v45 = vpop.permute.xlu1 %285 }
 0x282   : > { %v919_v38 = vpop.eup %918 }
 0x283   : > { %v206_v41 = vmul.f32 %v919_v38, %v915_v30 }
 0x284   : > { %v435_v47 = vpop.permute.xlu1 %434 }
 0x286   : > { %v921_v39 = vpop.eup %920 }
 0x287   : > { %v207_v42 = vmul.f32 %v921_v39, %v917_v32 }
 0x288   : > { %v586_v49 = vpop.permute.xlu1 %585 }
 0x289   : > { %v208_v44 = vpack.c.bf16 %v207_v42, %v206_v41  ;;  %v591_v50 = vsel %vm136_vm1, %v586_v49, 0 }
 0x28b   : > { %846 = vmatmul.mubr.msk.bf16.vlgmr.msra.gmra.mxu1 %vm184_vm4, %v208_v44 }
 0x28c   : > { %850 = vmatpush3.bf16.xpose.msra.mxu1 %v293_v43  ;;  %851 = vmatprep.mubr.msk.bf16.mxu1 %vm955_vm0, %v954_v0  ;;  %v584_v51 = vpop.permute.xlu1 %583 }
 0x28d   : > { %861 = vmatprep.subr.bf16.mxu1 %v954_v0 }
 0x293   : > { %852 = vmatmul.mubr.msk.bf16.vlgmr.msra.gmra.mxu1 %vm136_vm1, %v286_v45 }
 0x294   : > { %862 = vmatpush3.bf16.xpose.msra.mxu1 %v442_v48  ;;  %863 = vmatprep.mubr.msk.bf16.mxu1 %vm955_vm0, %v954_v0 }
 0x295   : > { %873 = vmatprep.subr.bf16.mxu1 %v954_v0 }
 0x29b   : > { %864 = vmatmul.mubr.msk.bf16.vlgmr.msra.gmra.mxu1 %vm136_vm1, %v435_v47 }
 0x29c   : > { %874 = vmatpush3.bf16.xpose.msra.mxu1 %v591_v50  ;;  %875 = vmatprep.mubr.msk.bf16.mxu1 %vm955_vm0, %v954_v0 }
 0x2a3   : > { %876 = vmatmul.mubr.msk.bf16.vlgmr.msra.gmra.mxu1 %vm136_vm1, %v584_v51  ;;  %vm569_vm1 = vcmask 191616  }
 0x34b   : > { %v255_v52 = vpop.f32.mrf.mxu1 }
 0x34c   : > { %v813_v53 = vpack.c.bf16 %v255_v52, %v255_v52 }
 0x34d   : > { %v847_v54 = vpop.f32.mrf.mxu1 }
 0x34e   : > { %271 = vst.msk [vmem:[%s1062_s22] sm:$0xf] %vm270_vm8, %v813_v53 }
 0x34f   : > { %v258_v55 = vpop.f32.mrf.mxu1 }
 0x350   : > { %v814_v57 = vpack.c.bf16 %v258_v55, %v258_v55 }
 0x351   : > { %v848_v58 = vpop.f32.mrf.mxu1 }
 0x352   : > { %v276_v59 = vsel %vm274_vm11, %v814_v57, %v275_v56 }
 0x353   : > { %277 = vst [vmem:[%s1062_s22 + $0x4] sm:$0x1] %v276_v59  ;;  %v329_v60 = vpop.f32.mrf.mxu1 }
 0x354   : > { %v330_v61 = vadd.f32 %v329_v60, %v1012_v8 }
 0x355   : > { %v853_v62 = vpop.f32.mrf.mxu1 }
 0x356   : > { %v336_v63 = vsel %vm184_vm4, %v330_v61, -inf }
 0x357   : > { %337 = vmax.xlane.f32.xlu1 %v336_v63  ;;  %v332_v1 = vpop.f32.mrf.mxu1 }
 0x358   : > { %v333_v2 = vadd.f32 %v332_v1, %v1016_v12 }
 0x359   : > { %v854_v3 = vpop.f32.mrf.mxu1 }
 0x35a   : > { %v339_v4 = vsel %vm188_vm5, %v333_v2, -inf }
 0x35b   : > { %340 = vmax.xlane.f32.xlu0 %v339_v4  ;;  %v478_v5 = vpop.f32.mrf.mxu1 }
 0x35c   : > { %v479_v6 = vadd.f32 %v478_v5, %v1012_v8 }
 0x35d   : > { %v865_v7 = vpop.f32.mrf.mxu1 }
 0x35e   : > { %v485_v9 = vsel %vm184_vm4, %v479_v6, -inf }
 0x35f   : > { %486 = vmax.xlane.f32.xlu1 %v485_v9  ;;  %v481_v10 = vpop.f32.mrf.mxu1 }
 0x360   : > { %v482_v11 = vadd.f32 %v481_v10, %v1016_v12 }
 0x361   : > { %v866_v13 = vpop.f32.mrf.mxu1 }
 0x362   : > { %v488_v14 = vsel %vm188_vm5, %v482_v11, -inf }
 0x363   : > { %489 = vmax.xlane.f32.xlu0 %v488_v14  ;;  %v627_v15 = vpop.f32.mrf.mxu1 }
 0x364   : > { %v628_v16 = vadd.f32 %v627_v15, %v1012_v8 }
 0x365   : > { %v877_v17 = vpop.f32.mrf.mxu1 }
 0x366   : > { %v634_v19 = vsel %vm184_vm4, %v628_v16, -inf }
 0x367   : > { %635 = vmax.xlane.f32.xlu1 %v634_v19  ;;  %v630_v20 = vpop.f32.mrf.mxu1 }
 0x368   : > { %v631_v21 = vadd.f32 %v630_v20, %v1016_v12 }
 0x369   : > { %v878_v22 = vpop.f32.mrf.mxu1 }
 0x36a   : > { %v637_v23 = vsel %vm188_vm5, %v631_v21, -inf }
 0x36b   : > { %638 = vmax.xlane.f32.xlu0 %v637_v23 }
 0x378   : > { %359 = vrot.lane.b32.xlu1 %v1032_v34, %s965_s23 }
 0x3e0   : > { %v338_v24 = vpop.xlane.xlu1 %337 }
 0x3e1   : > { %v342_v25 = vsub.f32 %v330_v61, %v338_v24 }
 0x3e3   : > { %v344_v27 = vmul.f32 1.442695, %v342_v25 }
 0x3e4   : > { %v341_v28 = vpop.xlane.xlu0 %340 }
 0x3e5   : > { %922 = vpow2.f32 %v344_v27  ;;  %v343_v8 = vsub.f32 %v333_v2, %v341_v28 }
 0x3e7   : > { %v346_v29 = vmul.f32 1.442695, %v343_v8 }
 0x3e8   : > { %v487_v30 = vpop.xlane.xlu1 %486 }
 0x3e9   : > { %924 = vpow2.f32 %v346_v29  ;;  %v491_v31 = vsub.f32 %v479_v6, %v487_v30 }
 0x3eb   : > { %v493_v32 = vmul.f32 1.442695, %v491_v31 }
 0x3ec   : > { %v490_v33 = vpop.xlane.xlu0 %489 }
 0x3ed   : > { %926 = vpow2.f32 %v493_v32  ;;  %v492_v12 = vsub.f32 %v482_v11, %v490_v33 }
 0x3ef   : > { %v495_v36 = vmul.f32 1.442695, %v492_v12 }
 0x3f0   : > { %v636_v37 = vpop.xlane.xlu1 %635 }
 0x3f1   : > { %928 = vpow2.f32 %v495_v36  ;;  %v640_v38 = vsub.f32 %v628_v16, %v636_v37  ;;  %v424_v36 = vld [vmem:[%s1062_s22 + $0x4] sm:$0x1] }
 0x3f2   : > { %v923_v39 = vpop.eup %922 }
 0x3f3   : > { %v642_v34 = vmul.f32 1.442695, %v640_v38  ;;  %v348_v40 = vsel %vm184_vm4, %v923_v39, 0.0 }
 0x3f4   : > { %v639_v41 = vpop.xlane.xlu0 %638  ;;  %349 = vadd.xlane.f32.xlu1 %v348_v40  ;;  %v360_v42 = vpop.permute.xlu1 %359 }
 0x3f5   : > { %930 = vpow2.f32 %v642_v34  ;;  %v641_v43 = vsub.f32 %v631_v21, %v639_v41  ;;  %v365_v44 = vand.u32 %v360_v42, %v1025_v26 }
 0x3f6   : > { %v925_v45 = vpop.eup %924 }
 0x3f7   : > { %v644_v46 = vmul.f32 1.442695, %v641_v43  ;;  %v351_v47 = vsel %vm188_vm5, %v925_v45, 0.0  ;;  %856 = vmatpush3.bf16.msra.mxu0 %v365_v44 }
 0x3f8   : > { %352 = vadd.xlane.f32.xlu0 %v351_v47  ;;  %867 = vmatprep.subr.bf16.mxu0 %v954_v0 }
 0x3f9   : > { %932 = vpow2.f32 %v644_v46 }
 0x3fa   : > { %v927_v48 = vpop.eup %926 }
 0x3fb   : > { %v497_v49 = vsel %vm184_vm4, %v927_v48, 0.0 }
 0x3fc   : > { %498 = vadd.xlane.f32.xlu1 %v497_v49 }
 0x3fe   : > { %v929_v50 = vpop.eup %928 }
 0x3ff   : > { %v500_v51 = vsel %vm188_vm5, %v929_v50, 0.0 }
 0x400   : > { %501 = vadd.xlane.f32.xlu0 %v500_v51 }
 0x402   : > { %v931_v52 = vpop.eup %930 }
 0x403   : > { %v646_v53 = vsel %vm184_vm4, %v931_v52, 0.0 }
 0x404   : > { %647 = vadd.xlane.f32.xlu1 %v646_v53 }
 0x406   : > { %v933_v54 = vpop.eup %932 }
 0x407   : > { %v649_v55 = vsel %vm188_vm5, %v933_v54, 0.0 }
 0x408   : > { %650 = vadd.xlane.f32.xlu0 %v649_v55 }
 0x415   : > { %657 = vrot.lane.b32.xlu1 %v1038_v35, %s966_s24 }
 0x41e   : > { %508 = vrot.lane.b32.xlu0 %v1022_v18, %s967_s25 }
 0x47d   : > { %v350_v56 = vpop.xlane.xlu1 %349 }
 0x47e   : > { %934 = vrcp.f32 %v350_v56 }
 0x481   : > { %v353_v57 = vpop.xlane.xlu0 %352 }
 0x482   : > { %936 = vrcp.f32 %v353_v57 }
 0x485   : > { %v499_v58 = vpop.xlane.xlu1 %498 }
 0x486   : > { %938 = vrcp.f32 %v499_v58 }
 0x489   : > { %v502_v59 = vpop.xlane.xlu0 %501 }
 0x48a   : > { %940 = vrcp.f32 %v502_v59 }
 0x48b   : > { %v935_v60 = vpop.eup %934 }
 0x48c   : > { %v356_v63 = vmul.f32 %v935_v60, %v923_v39 }
 0x48d   : > { %v648_v61 = vpop.xlane.xlu1 %647 }
 0x48e   : > { %942 = vrcp.f32 %v648_v61 }
 0x48f   : > { %v937_v62 = vpop.eup %936 }
 0x490   : > { %v357_v1 = vmul.f32 %v937_v62, %v925_v45 }
 0x491   : > { %v651_v2 = vpop.xlane.xlu0 %650  ;;  %v658_v5 = vpop.permute.xlu1 %657 }
 0x492   : > { %944 = vrcp.f32 %v651_v2  ;;  %v358_v35 = vpack.c.bf16 %v357_v1, %v356_v63  ;;  %v663_v10 = vand.u32 %v658_v5, %v1025_v26 }
 0x493   : > { %v939_v18 = vpop.eup %938 }
 0x494   : > { %858 = vmatmul.mubr.msk.bf16.vlgmr.msra.gmra.mxu0 %vm184_vm4, %v358_v35  ;;  %v505_v7 = vmul.f32 %v939_v18, %v927_v48 }
 0x495   : > { %v509_v3 = vpop.permute.xlu0 %508  ;;  %869 = vmatprep.mubr.msk.bf16.mxu0 %vm955_vm0, %v954_v0 }
 0x496   : > { %v514_v4 = vand.u32 %v509_v3, %v1025_v26 }
 0x497   : > { %v941_v6 = vpop.eup %940 }
 0x498   : > { %868 = vmatpush3.bf16.msra.mxu0 %v514_v4  ;;  %v506_v9 = vmul.f32 %v941_v6, %v929_v50 }
 0x499   : > { %879 = vmatprep.subr.bf16.mxu0 %v954_v0 }
 0x49a   : > { %v507_v11 = vpack.c.bf16 %v506_v9, %v505_v7 }
 0x49b   : > { %v943_v13 = vpop.eup %942 }
 0x49c   : > { %870 = vmatmul.mubr.msk.bf16.vlgmr.msra.gmra.mxu0 %vm184_vm4, %v507_v11  ;;  %v654_v15 = vmul.f32 %v943_v13, %v931_v52 }
 0x49d   : > { %880 = vmatpush3.bf16.msra.mxu0 %v663_v10  ;;  %881 = vmatprep.mubr.msk.bf16.mxu0 %vm955_vm0, %v954_v0  ;;  %vm572_vm0 = vmand %vm571_vm15, %vm273_vm10 }
 0x49f   : > { %v945_v14 = vpop.eup %944 }
 0x4a0   : > { %v655_v16 = vmul.f32 %v945_v14, %v933_v54 }
 0x4a2   : > { %v656_v17 = vpack.c.bf16 %v655_v16, %v654_v15 }
 0x4a4   : > { %882 = vmatmul.mubr.msk.bf16.vlgmr.msra.gmra.mxu0 %vm184_vm4, %v656_v17  ;;  %vm721_vm4 = vmand %vm720_vm2, %vm273_vm10 }
 0x554   : > { %v401_v19 = vpop.f32.mrf.mxu0 }
 0x555   : > { %v815_v24 = vpack.c.bf16 %v401_v19, %v401_v19 }
 0x556   : > { %v859_v20 = vpop.f32.mrf.mxu0 }
 0x558   : > { %v404_v21 = vpop.f32.mrf.mxu0 }
 0x559   : > { %v816_v26 = vpack.c.bf16 %v404_v21, %v404_v21 }
 0x55a   : > { %v860_v22 = vpop.f32.mrf.mxu0 }
 0x55b   : > { %416 = vrot.lane.b32.xlu1 %v816_v26, %s968_s26 }
 0x55c   : > { %v550_v23 = vpop.f32.mrf.mxu0 }
 0x55d   : > { %v817_v29 = vpack.c.bf16 %v550_v23, %v550_v23 }
 0x55e   : > { %v871_v25 = vpop.f32.mrf.mxu0 }
 0x55f   : > { %414 = vrot.lane.b32.xlu1 %v815_v24, %s968_s26 }
 0x560   : > { %v553_v27 = vpop.f32.mrf.mxu0 }
 0x561   : > { %v818_v28 = vpack.c.bf16 %v553_v27, %v553_v27 }
 0x562   : > { %v872_v0 = vpop.f32.mrf.mxu0 }
 0x563   : > { %565 = vrot.lane.b32.xlu0 %v818_v28, %s969_s27 }
 0x564   : > { %v699_v8 = vpop.f32.mrf.mxu0 }
 0x565   : > { %v819_v32 = vpack.c.bf16 %v699_v8, %v699_v8 }
 0x566   : > { %v883_v30 = vpop.f32.mrf.mxu0 }
 0x567   : > { %563 = vrot.lane.b32.xlu0 %v817_v29, %s969_s27 }
 0x568   : > { %v702_v31 = vpop.f32.mrf.mxu0 }
 0x569   : > { %v820_v33 = vpack.c.bf16 %v702_v31, %v702_v31 }
 0x56a   : > { %v884_v12 = vpop.f32.mrf.mxu0 }
 0x56b   : > { %712 = vrot.lane.b32.xlu0 %v819_v32, %s970_s28  ;;  %714 = vrot.lane.b32.xlu1 %v820_v33, %s970_s28 }
 0x5cd   : > { %v417_v37 = vpop.permute.xlu1 %416 }
 0x5ce   : > { %v425_v38 = vsel %vm423_vm13, %v417_v37, %v424_v36 }
 0x5cf   : > { %426 = vst [vmem:[%s1062_s22 + $0x4] sm:$0x1] %v425_v38 }
 0x5d1   : > { %v415_v39 = vpop.permute.xlu1 %414 }
 0x5d2   : > { %421 = vst.msk [vmem:[%s1062_s22] sm:$0xf] %vm420_vm14, %v415_v39 }
 0x5d5   : > { %v566_v34 = vpop.permute.xlu0 %565 }
 0x5d6   : > { %v573_v40 = vld [vmem:[%s1062_s22 + $0x4] sm:$0x1] }
 0x5d7   : > { %v574_v41 = vsel %vm572_vm0, %v566_v34, %v573_v40 }
 0x5d8   : > { %575 = vst [vmem:[%s1062_s22 + $0x4] sm:$0x1] %v574_v41 }
 0x5d9   : > { %v564_v42 = vpop.permute.xlu0 %563 }
 0x5da   : > { %570 = vst.msk [vmem:[%s1062_s22] sm:$0xf] %vm569_vm1, %v564_v42 }
 0x5dd   : > { %v713_v43 = vpop.permute.xlu0 %712  ;;  %v715_v45 = vpop.permute.xlu1 %714 }
 0x5de   : > { %719 = vst.msk [vmem:[%s1062_s22] sm:$0xf] %vm718_vm3, %v713_v43 }
 0x5df   : > { %v722_v44 = vld [vmem:[%s1062_s22 + $0x4] sm:$0x1] }
 0x5e0   : > { %v723_v46 = vsel %vm721_vm4, %v715_v45, %v722_v44 }
 0x5e1   : > { %724 = vst [vmem:[%s1062_s22 + $0x4] sm:$0x1] %v723_v46 }
 0x5e2 PF: > { %s11_s6 = sadd.s32 1, %s952_s6  }
 0x5e3   : > { %p8_p4 = scmp.ge.s32.totalorder %s11_s6, 4  }
 0x5e5   :  { %10 = sbr.rel (!%p8_p4) target bundleno = 1 (0x1), region = 54 }

// kernel: trans_forward.18
= control target key start
LH: loop header
LB: loop body
LE: loop exit
PB: predicated region body
PF: predicated region fallthrough
CT: control target
= control target key end

     0   :  { %vm58_vm0 = vcmask 261120   ;;  %vm195_vm1 = vcmask 257024   ;;  %s323_s1 = inlined_call_operand.vmem [shape: bf16[32,32], index: 1, kind: input, shape index: {}]   ;;  %s324_s0 = inlined_call_operand.vmem [shape: bf16[24,32], index: 0, kind: input, shape index: {}]   ;;  %s325_s3 = inlined_call_operand.vmem [shape: bf16[24,32], index: 3, kind: input, shape index: {}]   ;;  %s326_s2 = inlined_call_operand.vmem [shape: f32[1,32], index: 2, kind: input, shape index: {}]   ;;  %s327_s4 = inlined_call_operand.vmem [shape: f32[1,32], index: 4, kind: input, shape index: {}]   ;;  %s328_s5 = inlined_call_operand.vmem [shape: f32[1,32], index: 5, kind: input, shape index: {}]   ;;  %s329_s6 = inlined_call_operand.vmem [shape: bf16[24,32], index: 6, kind: output, shape index: {}]  }
   0x1   :  { %v234_v0 = vld [vmem:[%s323_s1 + $0x8] sm:$0xff]   ;;  %v235_v1 = vld [vmem:[%s323_s1] sm:$0xff]  }
   0x2   :  { %226 = vmatprep.subr.bf16.mxu0 %v234_v0  ;;  %v236_v2 = vld [vmem:[%s324_s0] sm:$0xff]   ;;  %v237_v3 = vld [vmem:[%s324_s0 + $0x8] ss:$0 sps:$4 sm:$0xff]  }
   0x3   :  { %227 = vmatpush3.bf16.msra.mxu0 %v234_v0  ;;  %230 = vmatprep.mubr.msk.bf16.mxu0 %vm58_vm0, %v236_v2  ;;  %v115_v4 = vld [vmem:[%s325_s3 + $0x8] sm:$0xf]  ;;  %v203_v5 = vld [vmem:[%s326_s2] ss:$0 sm:$0xff] }
   0x4   :  { %228 = vmatprep.subr.bf16.mxu0 %v235_v1  ;;  %v219_v6 = vld [vmem:[%s325_s3] sm:$0xff]   ;;  %v118_v7 = vunpack.c.l.bf16 %v115_v4 }
   0x5   :  { %v220_v10 = vunpack.c.l.bf16 %v219_v6  ;;  %v221_v17 = vunpack.c.h.bf16 %v219_v6  ;;  %v210_v48 = vld [vmem:[%s327_s4] ss:$0 sm:$0xff] }
   0x6   :  { %v211_v50 = vld [vmem:[%s328_s5] ss:$0 sm:$0xff] }
   0x7   :  { %229 = vmatpush3.bf16.msra.mxu0 %v235_v1 }
   0xa   :  { %231 = vmatmul.mubr.msk.bf16.vlgmr.msra.gmra.mxu0 %vm58_vm0, %v237_v3 }
  0xca   :  { %v232_v8 = vpop.f32.mrf.mxu0 }
  0xcb   :  { %v108_v9 = vadd.f32 %v232_v8, %v203_v5 }
  0xcc   :  { %v99_v11 = vpop.f32.mrf.mxu0 }
  0xcd   :  { %v100_v12 = vadd.f32 %v203_v5, %v99_v11  ;;  %v121_v13 = vadd.f32 %v118_v7, %v108_v9 }
  0xce   :  { %v233_v14 = vpop.f32.mrf.mxu0 }
  0xcf   :  { %v130_v15 = vsel %vm58_vm0, %v121_v13, 0.0  ;;  %v119_v16 = vadd.f32 %v220_v10, %v100_v12 }
  0xd0   :  { %131 = vadd.xlane.f32.xlu1 %v130_v15  ;;  %v102_v18 = vpop.f32.mrf.mxu0 }
  0xd1   :  { %v103_v19 = vadd.f32 %v203_v5, %v102_v18  ;;  %v124_v20 = vsel %vm58_vm0, %v119_v16, 0.0 }
  0xd2   :  { %125 = vadd.xlane.f32.xlu0 %v124_v20 }
  0xd3   :  { %v120_v21 = vadd.f32 %v221_v17, %v103_v19 }
  0xd5   :  { %v127_v22 = vsel %vm58_vm0, %v120_v21, 0.0 }
  0xd6   :  { %128 = vadd.xlane.f32.xlu0 %v127_v22 }
 0x159   :  { %v132_v23 = vpop.xlane.xlu1 %131 }
 0x15a   :  { %v136_v24 = vmul.f32 0.03125, %v132_v23 }
 0x15b   :  { %v126_v25 = vpop.xlane.xlu0 %125 }
 0x15c   :  { %v134_v26 = vmul.f32 0.03125, %v126_v25  ;;  %v139_v27 = vsub.f32 %v121_v13, %v136_v24 }
 0x15e   :  { %v137_v28 = vsub.f32 %v119_v16, %v134_v26  ;;  %v142_v34 = vmul.f32 %v139_v27, %v139_v27 }
 0x15f   :  { %v129_v29 = vpop.xlane.xlu0 %128 }
 0x160   :  { %v135_v30 = vmul.f32 0.03125, %v129_v29  ;;  %v140_v31 = vmul.f32 %v137_v28, %v137_v28  ;;  %v149_v36 = vsel %vm58_vm0, %v142_v34, 0.0 }
 0x162   :  { %v138_v32 = vsub.f32 %v120_v21, %v135_v30  ;;  %v143_v33 = vsel %vm58_vm0, %v140_v31, 0.0 }
 0x163   :  { %144 = vadd.xlane.f32.xlu1 %v143_v33 }
 0x164   :  { %v141_v35 = vmul.f32 %v138_v32, %v138_v32 }
 0x166   :  { %v146_v37 = vsel %vm58_vm0, %v141_v35, 0.0 }
 0x167   :  { %150 = vadd.xlane.f32.xlu1 %v149_v36  ;;  %147 = vadd.xlane.f32.xlu0 %v146_v37 }
 0x1ec   :  { %v145_v38 = vpop.xlane.xlu1 %144 }
 0x1ed   :  { %v152_v39 = vmul.f32 0.03125, %v145_v38 }
 0x1ef   :  { %v155_v40 = vadd.f32 1e-05, %v152_v39 }
 0x1f0   :  { %v151_v41 = vpop.xlane.xlu1 %150  ;;  %v148_v42 = vpop.xlane.xlu0 %147 }
 0x1f1   :  { %238 = vrsqrt.f32 %v155_v40  ;;  %v154_v43 = vmul.f32 0.03125, %v151_v41  ;;  %v153_v44 = vmul.f32 0.03125, %v148_v42 }
 0x1f3   :  { %v157_v45 = vadd.f32 1e-05, %v154_v43  ;;  %v156_v46 = vadd.f32 1e-05, %v153_v44 }
 0x1f5   :  { %240 = vrsqrt.f32 %v157_v45 }
 0x1f6   :  { %242 = vrsqrt.f32 %v156_v46 }
 0x1fe   :  { %v239_v47 = vpop.eup %238 }
 0x1ff   :  { %v161_v49 = vmul.f32 %v239_v47, %v137_v28 }
 0x201   :  { %v170_v51 = vmul.f32 %v210_v48, %v161_v49 }
 0x202   :  { %v241_v52 = vpop.eup %240 }
 0x203   :  { %v243_v53 = vpop.eup %242  ;;  %v179_v54 = vadd.f32 %v211_v50, %v170_v51  ;;  %v163_v55 = vmul.f32 %v241_v52, %v139_v27 }
 0x204   :  { %v162_v56 = vmul.f32 %v243_v53, %v138_v32 }
 0x205   :  { %v215_v57 = vpack.c.bf16 %v179_v54, %v179_v54  ;;  %v172_v58 = vmul.f32 %v210_v48, %v163_v55 }
 0x206   :  { %v171_v59 = vmul.f32 %v210_v48, %v162_v56 }
 0x207   :  { %196 = vst.msk [vmem:[%s329_s6] sm:$0xf] %vm195_vm1, %v215_v57  ;;  %v181_v60 = vadd.f32 %v211_v50, %v172_v58 }
 0x208   :  { %v180_v61 = vadd.f32 %v211_v50, %v171_v59 }
 0x209   :  { %v217_v62 = vpack.c.bf16 %v181_v60, %v181_v60 }
 0x20a   :  { %v216_v63 = vpack.c.bf16 %v180_v61, %v180_v61 }
 0x20b   :  { %198 = vst.msk [vmem:[%s329_s6 + $0x8] sm:$0xf] %vm195_vm1, %v217_v62 }
 0x20c   :  { %197 = vst.msk [vmem:[%s329_s6 + $0x4] sm:$0xf] %vm195_vm1, %v216_v63 }

// kernel: trans_forward.19
= control target key start
LH: loop header
LB: loop body
LE: loop exit
PB: predicated region body
PF: predicated region fallthrough
CT: control target
= control target key end

     0   :  { %vm49_vm0 = vcmask 261120   ;;  %vm132_vm1 = vcmask 519168   ;;  %s219_s1 = inlined_call_operand.vmem [shape: bf16[32,64], index: 1, kind: input, shape index: {}]   ;;  %s220_s0 = inlined_call_operand.vmem [shape: bf16[24,32], index: 0, kind: input, shape index: {}]   ;;  %s221_s2 = inlined_call_operand.vmem [shape: f32[1,64], index: 2, kind: input, shape index: {}]   ;;  %s222_s3 = inlined_call_operand.vmem [shape: bf16[24,64], index: 3, kind: output, shape index: {}]  }
   0x1   :  { %v165_v0 = vld [vmem:[%s219_s1 + $0x8] sm:$0xff]   ;;  %v166_v1 = vld [vmem:[%s219_s1] sm:$0xff]  }
   0x2   :  { %157 = vmatprep.subr.bf16.mxu0 %v165_v0  ;;  %v167_v2 = vld [vmem:[%s220_s0] sm:$0xff]   ;;  %v168_v3 = vld [vmem:[%s220_s0 + $0x8] ss:$0 sps:$4 sm:$0xff]  }
   0x3   :  { %158 = vmatpush3.bf16.msra.mxu0 %v165_v0  ;;  %161 = vmatprep.mubr.msk.bf16.mxu0 %vm49_vm0, %v167_v2  ;;  %v140_v4 = vld [vmem:[%s221_s2] ss:$0 sm:$0xff] }
   0x4   :  { %159 = vmatprep.subr.bf16.mxu0 %v166_v1 }
   0x7   :  { %160 = vmatpush3.bf16.msra.mxu0 %v166_v1 }
   0xa   :  { %162 = vmatmul.mubr.msk.bf16.vlgmr.msra.gmra.mxu0 %vm49_vm0, %v168_v3 }
  0xca   :  { %v163_v5 = vpop.f32.mrf.mxu0 }
  0xcb   :  { %v99_v6 = vadd.f32 %v163_v5, %v140_v4 }
  0xcc   :  { %v90_v7 = vpop.f32.mrf.mxu0 }
  0xcd   :  { %v109_v8 = vmul.f32 0.70710677, %v99_v6  ;;  %v91_v9 = vadd.f32 %v140_v4, %v90_v7  ;;  %v106_v16 = vmul.f32 0.5, %v99_v6 }
  0xce   :  { %v164_v10 = vpop.f32.mrf.mxu0 }
  0xcf   :  { %169 = verf.f32 %v109_v8  ;;  %v107_v11 = vmul.f32 0.70710677, %v91_v9  ;;  %v104_v20 = vmul.f32 0.5, %v91_v9 }
  0xd0   :  { %v93_v12 = vpop.f32.mrf.mxu0 }
  0xd1   :  { %171 = verf.f32 %v107_v11  ;;  %v94_v13 = vadd.f32 %v140_v4, %v93_v12 }
  0xd3   :  { %v108_v14 = vmul.f32 0.70710677, %v94_v13  ;;  %v105_v26 = vmul.f32 0.5, %v94_v13 }
  0xd5   :  { %173 = verf.f32 %v108_v14 }
  0xdc   :  { %v170_v15 = vpop.eup %169 }
  0xdd   :  { %v115_v17 = vadd.f32 1.0, %v170_v15 }
  0xde   :  { %v172_v18 = vpop.eup %171 }
  0xdf   :  { %v118_v19 = vmul.f32 %v115_v17, %v106_v16  ;;  %v113_v21 = vadd.f32 1.0, %v172_v18 }
  0xe1   :  { %v152_v22 = vpack.c.bf16 %v118_v19, %v118_v19  ;;  %v116_v23 = vmul.f32 %v113_v21, %v104_v20 }
  0xe2   :  { %v174_v24 = vpop.eup %173 }
  0xe3   :  { %135 = vst.msk [vmem:[%s222_s3 + $0x8] sm:$0xf] %vm132_vm1, %v152_v22  ;;  %v150_v25 = vpack.c.bf16 %v116_v23, %v116_v23  ;;  %v114_v27 = vadd.f32 1.0, %v174_v24 }
  0xe5   :  { %133 = vst.msk [vmem:[%s222_s3] sm:$0xf] %vm132_vm1, %v150_v25  ;;  %v117_v28 = vmul.f32 %v114_v27, %v105_v26 }
  0xe7   :  { %v151_v29 = vpack.c.bf16 %v117_v28, %v117_v28 }
  0xe9   :  { %134 = vst.msk [vmem:[%s222_s3 + $0x4] sm:$0xf] %vm132_vm1, %v151_v29 }

// kernel: trans_forward.20
= control target key start
LH: loop header
LB: loop body
LE: loop exit
PB: predicated region body
PF: predicated region fallthrough
CT: control target
= control target key end

     0   :  { %vm74_vm0 = vcmask 523264   ;;  %vm140_vm1 = vcmask 261120   ;;  %vm212_vm2 = vcmask 257024   ;;  %s354_s1 = inlined_call_operand.vmem [shape: bf16[64,32], index: 1, kind: input, shape index: {}]   ;;  %s355_s0 = inlined_call_operand.vmem [shape: bf16[24,64], index: 0, kind: input, shape index: {}]   ;;  %s356_s3 = inlined_call_operand.vmem [shape: bf16[24,32], index: 3, kind: input, shape index: {}]   ;;  %s357_s2 = inlined_call_operand.vmem [shape: f32[1,32], index: 2, kind: input, shape index: {}]   ;;  %s358_s4 = inlined_call_operand.vmem [shape: f32[1,32], index: 4, kind: input, shape index: {}]   ;;  %s359_s5 = inlined_call_operand.vmem [shape: f32[1,32], index: 5, kind: input, shape index: {}]   ;;  %s360_s6 = inlined_call_operand.vmem [shape: bf16[24,32], index: 6, kind: output, shape index: {}]  }
   0x1   :  { %v259_v0 = vld [vmem:[%s354_s1 + $0x18] sm:$0xff]   ;;  %v260_v1 = vld [vmem:[%s354_s1 + $0x10] sm:$0xff]   ;;  %v261_v2 = vld [vmem:[%s354_s1 + $0x8] sm:$0xff]  }
   0x2   :  { %247 = vmatprep.subr.bf16.mxu0 %v259_v0  ;;  %v263_v3 = vld [vmem:[%s355_s0] sm:$0xff]   ;;  %v264_v5 = vld [vmem:[%s355_s0 + $0x8] ss:$0 sps:$4 sm:$0xff]  }
   0x3   :  { %248 = vmatpush3.bf16.msra.mxu0 %v259_v0  ;;  %255 = vmatprep.mubr.msk.bf16.mxu0 %vm74_vm0, %v263_v3  ;;  %v262_v4 = vld [vmem:[%s354_s1] sm:$0xff]   ;;  %v131_v6 = vld [vmem:[%s356_s3 + $0x8] sm:$0xf] }
   0x4   :  { %249 = vmatprep.subr.bf16.mxu0 %v260_v1  ;;  %v220_v7 = vld [vmem:[%s357_s2] ss:$0 sm:$0xff]  ;;  %v134_v9 = vunpack.c.l.bf16 %v131_v6 }
   0x5   :  { %v238_v8 = vld [vmem:[%s356_s3] sm:$0xff]  }
   0x6   :  { %v239_v12 = vunpack.c.l.bf16 %v238_v8  ;;  %v240_v19 = vunpack.c.h.bf16 %v238_v8  ;;  %v229_v50 = vld [vmem:[%s358_s4] ss:$0 sm:$0xff] }
   0x7   :  { %250 = vmatpush3.bf16.msra.mxu0 %v260_v1  ;;  %v230_v52 = vld [vmem:[%s359_s5] ss:$0 sm:$0xff] }
   0x8   :  { %251 = vmatprep.subr.bf16.mxu0 %v261_v2 }
   0xb   :  { %252 = vmatpush3.bf16.msra.mxu0 %v261_v2 }
   0xc   :  { %253 = vmatprep.subr.bf16.mxu0 %v262_v4 }
   0xf   :  { %254 = vmatpush3.bf16.msra.mxu0 %v262_v4 }
  0x12   :  { %256 = vmatmul.mubr.msk.bf16.vlgmr.msra.gmra.mxu0 %vm74_vm0, %v264_v5 }
  0xd2   :  { %v257_v10 = vpop.f32.mrf.mxu0 }
  0xd3   :  { %v124_v11 = vadd.f32 %v257_v10, %v220_v7 }
  0xd4   :  { %v115_v13 = vpop.f32.mrf.mxu0 }
  0xd5   :  { %v116_v14 = vadd.f32 %v220_v7, %v115_v13  ;;  %v137_v15 = vadd.f32 %v134_v9, %v124_v11 }
  0xd6   :  { %v258_v16 = vpop.f32.mrf.mxu0 }
  0xd7   :  { %v147_v17 = vsel %vm140_vm1, %v137_v15, 0.0  ;;  %v135_v18 = vadd.f32 %v239_v12, %v116_v14 }
  0xd8   :  { %148 = vadd.xlane.f32.xlu1 %v147_v17  ;;  %v118_v20 = vpop.f32.mrf.mxu0 }
  0xd9   :  { %v119_v21 = vadd.f32 %v220_v7, %v118_v20  ;;  %v141_v22 = vsel %vm140_vm1, %v135_v18, 0.0 }
  0xda   :  { %142 = vadd.xlane.f32.xlu0 %v141_v22 }
  0xdb   :  { %v136_v23 = vadd.f32 %v240_v19, %v119_v21 }
  0xdd   :  { %v144_v24 = vsel %vm140_vm1, %v136_v23, 0.0 }
  0xde   :  { %145 = vadd.xlane.f32.xlu0 %v144_v24 }
 0x161   :  { %v149_v25 = vpop.xlane.xlu1 %148 }
 0x162   :  { %v153_v26 = vmul.f32 0.03125, %v149_v25 }
 0x163   :  { %v143_v27 = vpop.xlane.xlu0 %142 }
 0x164   :  { %v151_v28 = vmul.f32 0.03125, %v143_v27  ;;  %v156_v29 = vsub.f32 %v137_v15, %v153_v26 }
 0x166   :  { %v154_v30 = vsub.f32 %v135_v18, %v151_v28  ;;  %v159_v36 = vmul.f32 %v156_v29, %v156_v29 }
 0x167   :  { %v146_v31 = vpop.xlane.xlu0 %145 }
 0x168   :  { %v152_v32 = vmul.f32 0.03125, %v146_v31  ;;  %v157_v33 = vmul.f32 %v154_v30, %v154_v30  ;;  %v166_v38 = vsel %vm140_vm1, %v159_v36, 0.0 }
 0x16a   :  { %v155_v34 = vsub.f32 %v136_v23, %v152_v32  ;;  %v160_v35 = vsel %vm140_vm1, %v157_v33, 0.0 }
 0x16b   :  { %161 = vadd.xlane.f32.xlu1 %v160_v35 }
 0x16c   :  { %v158_v37 = vmul.f32 %v155_v34, %v155_v34 }
 0x16e   :  { %v163_v39 = vsel %vm140_vm1, %v158_v37, 0.0 }
 0x16f   :  { %167 = vadd.xlane.f32.xlu1 %v166_v38  ;;  %164 = vadd.xlane.f32.xlu0 %v163_v39 }
 0x1f4   :  { %v162_v40 = vpop.xlane.xlu1 %161 }
 0x1f5   :  { %v169_v41 = vmul.f32 0.03125, %v162_v40 }
 0x1f7   :  { %v172_v42 = vadd.f32 1e-05, %v169_v41 }
 0x1f8   :  { %v168_v43 = vpop.xlane.xlu1 %167  ;;  %v165_v44 = vpop.xlane.xlu0 %164 }
 0x1f9   :  { %265 = vrsqrt.f32 %v172_v42  ;;  %v171_v45 = vmul.f32 0.03125, %v168_v43  ;;  %v170_v46 = vmul.f32 0.03125, %v165_v44 }
 0x1fb   :  { %v174_v47 = vadd.f32 1e-05, %v171_v45  ;;  %v173_v48 = vadd.f32 1e-05, %v170_v46 }
 0x1fd   :  { %267 = vrsqrt.f32 %v174_v47 }
 0x1fe   :  { %269 = vrsqrt.f32 %v173_v48 }
 0x206   :  { %v266_v49 = vpop.eup %265 }
 0x207   :  { %v178_v51 = vmul.f32 %v266_v49, %v154_v30 }
 0x209   :  { %v187_v53 = vmul.f32 %v229_v50, %v178_v51 }
 0x20a   :  { %v268_v54 = vpop.eup %267 }
 0x20b   :  { %v270_v55 = vpop.eup %269  ;;  %v196_v56 = vadd.f32 %v230_v52, %v187_v53  ;;  %v180_v57 = vmul.f32 %v268_v54, %v156_v29 }
 0x20c   :  { %v179_v58 = vmul.f32 %v270_v55, %v155_v34 }
 0x20d   :  { %v234_v59 = vpack.c.bf16 %v196_v56, %v196_v56  ;;  %v189_v60 = vmul.f32 %v229_v50, %v180_v57 }
 0x20e   :  { %v188_v61 = vmul.f32 %v229_v50, %v179_v58 }
 0x20f   :  { %213 = vst.msk [vmem:[%s360_s6] sm:$0xf] %vm212_vm2, %v234_v59  ;;  %v198_v62 = vadd.f32 %v230_v52, %v189_v60 }
 0x210   :  { %v197_v63 = vadd.f32 %v230_v52, %v188_v61 }
 0x211   :  { %v236_v0 = vpack.c.bf16 %v198_v62, %v198_v62 }
 0x212   :  { %v235_v1 = vpack.c.bf16 %v197_v63, %v197_v63 }
 0x213   :  { %215 = vst.msk [vmem:[%s360_s6 + $0x8] sm:$0xf] %vm212_vm2, %v236_v0 }
 0x214   :  { %214 = vst.msk [vmem:[%s360_s6 + $0x4] sm:$0xf] %vm212_vm2, %v235_v1 }

// kernel: trans_forward.27
= control target key start
LH: loop header
LB: loop body
LE: loop exit
PB: predicated region body
PF: predicated region fallthrough
CT: control target
= control target key end

     0   :  { %v117_v0 = vmov 0.0   ;;  %vm118_vm0 = vmmov 0   ;;  %vm45_vm1 = vcmask 261120   ;;  %s157_s1 = inlined_call_operand.vmem [shape: bf16[32,128], index: 1, kind: input, shape index: {}]   ;;  %s158_s0 = inlined_call_operand.vmem [shape: bf16[16,32], index: 0, kind: input, shape index: {}]   ;;  %s159_s2 = inlined_call_operand.vmem [shape: f32[1,128], index: 2, kind: input, shape index: {}]   ;;  %s160_s3 = inlined_call_operand.vmem [shape: f32[16,128], index: 3, kind: output, shape index: {}]  }
   0x1   :  { %104 = vmatprep.subr.bf16.mxu0 %v117_v0  ;;  %v114_v1 = vld [vmem:[%s157_s1 + $0x8] sm:$0xff]   ;;  %108 = vmatprep.mubr.msk.bf16.mxu0 %vm118_vm0, %v117_v0  ;;  %v115_v2 = vld [vmem:[%s157_s1] sm:$0xff]  }
   0x2   :  { %105 = vmatpush3.bf16.msra.mxu0 %v114_v1  ;;  %v116_v3 = vld [vmem:[%s158_s0] sm:$0xff]  }
   0x3   :  { %106 = vmatprep.subr.bf16.mxu0 %v117_v0  ;;  %v96_v4 = vld [vmem:[%s159_s2] ss:$0 sm:$0xff] }
   0x6   :  { %107 = vmatpush3.bf16.msra.mxu0 %v115_v2 }
   0x9   :  { %109 = vmatmul.mubr.msk.bf16.vlgmr.msra.gmra.mxu0 %vm45_vm1, %v116_v3 }
  0xc9   :  { %v83_v5 = vpop.f32.mrf.mxu0 }
  0xca   :  { %v84_v6 = vadd.f32 %v96_v4, %v83_v5 }
  0xcb   :  { %v110_v7 = vpop.f32.mrf.mxu0 }
  0xcc   :  { %90 = vst [vmem:[%s160_s3] sm:$0xff] %v84_v6 }
  0xcd   :  { %v86_v8 = vpop.f32.mrf.mxu0 }
  0xce   :  { %v87_v9 = vadd.f32 %v96_v4, %v86_v8 }
  0xcf   :  { %v111_v10 = vpop.f32.mrf.mxu0 }
  0xd0   :  { %91 = vst [vmem:[%s160_s3 + $0x8] sm:$0xff] %v87_v9 }

// kernel: trans_forward.26
= control target key start
LH: loop header
LB: loop body
LE: loop exit
PB: predicated region body
PF: predicated region fallthrough
CT: control target
= control target key end

     0   :  { %v201_v0 = vmov 0.0   ;;  %vm202_vm0 = vmmov 0   ;;  %vm51_vm1 = vcmask 261120   ;;  %vm159_vm2 = vcmask 257024   ;;  %s262_s1 = inlined_call_operand.vmem [shape: bf16[32,32], index: 1, kind: input, shape index: {}]   ;;  %s263_s0 = inlined_call_operand.vmem [shape: bf16[16,32], index: 0, kind: input, shape index: {}]   ;;  %s264_s2 = inlined_call_operand.vmem [shape: f32[1,32], index: 2, kind: input, shape index: {}]   ;;  %s265_s3 = inlined_call_operand.vmem [shape: f32[1,32], index: 3, kind: input, shape index: {}]   ;;  %s266_s4 = inlined_call_operand.vmem [shape: f32[1,32], index: 4, kind: input, shape index: {}]   ;;  %s267_s5 = inlined_call_operand.vmem [shape: bf16[16,32], index: 5, kind: output, shape index: {}]  }
   0x1   :  { %180 = vmatprep.subr.bf16.mxu0 %v201_v0  ;;  %v190_v1 = vld [vmem:[%s262_s1 + $0x8] sm:$0xff]   ;;  %184 = vmatprep.mubr.msk.bf16.mxu0 %vm202_vm0, %v201_v0  ;;  %v191_v2 = vld [vmem:[%s262_s1] sm:$0xff]  }
   0x2   :  { %181 = vmatpush3.bf16.msra.mxu0 %v190_v1  ;;  %v192_v3 = vld [vmem:[%s263_s0] sm:$0xff]  }
   0x3   :  { %182 = vmatprep.subr.bf16.mxu0 %v201_v0  ;;  %v166_v4 = vld [vmem:[%s264_s2] ss:$0 sm:$0xff] }
   0x4   :  { %v171_v40 = vld [vmem:[%s265_s3] ss:$0 sm:$0xff] }
   0x5   :  { %v172_v42 = vld [vmem:[%s266_s4] ss:$0 sm:$0xff] }
   0x6   :  { %183 = vmatpush3.bf16.msra.mxu0 %v191_v2 }
   0x9   :  { %185 = vmatmul.mubr.msk.bf16.vlgmr.msra.gmra.mxu0 %vm51_vm1, %v192_v3 }
  0xc9   :  { %v89_v5 = vpop.f32.mrf.mxu0 }
  0xca   :  { %v90_v6 = vadd.f32 %v166_v4, %v89_v5 }
  0xcb   :  { %v186_v7 = vpop.f32.mrf.mxu0 }
  0xcc   :  { %v98_v8 = vmul.f32 0.70710677, %v90_v6  ;;  %v96_v14 = vmul.f32 0.5, %v90_v6 }
  0xcd   :  { %v92_v9 = vpop.f32.mrf.mxu0 }
  0xce   :  { %193 = verf.f32 %v98_v8  ;;  %v93_v10 = vadd.f32 %v166_v4, %v92_v9 }
  0xcf   :  { %v187_v11 = vpop.f32.mrf.mxu0 }
  0xd0   :  { %v99_v12 = vmul.f32 0.70710677, %v93_v10  ;;  %v97_v18 = vmul.f32 0.5, %v93_v10 }
  0xd2   :  { %195 = verf.f32 %v99_v12 }
  0xdb   :  { %v194_v13 = vpop.eup %193 }
  0xdc   :  { %v102_v15 = vadd.f32 1.0, %v194_v13 }
  0xde   :  { %v104_v16 = vmul.f32 %v102_v15, %v96_v14 }
  0xdf   :  { %v196_v17 = vpop.eup %195 }
  0xe0   :  { %v108_v19 = vsel %vm51_vm1, %v104_v16, 0.0  ;;  %v103_v20 = vadd.f32 1.0, %v196_v17 }
  0xe1   :  { %109 = vadd.xlane.f32.xlu0 %v108_v19 }
  0xe2   :  { %v105_v21 = vmul.f32 %v103_v20, %v97_v18 }
  0xe4   :  { %v111_v22 = vsel %vm51_vm1, %v105_v21, 0.0 }
  0xe5   :  { %112 = vadd.xlane.f32.xlu0 %v111_v22 }
 0x16a   :  { %v110_v23 = vpop.xlane.xlu0 %109 }
 0x16b   :  { %v115_v24 = vmul.f32 0.03125, %v110_v23 }
 0x16d   :  { %v117_v25 = vsub.f32 %v104_v16, %v115_v24 }
 0x16e   :  { %v113_v26 = vpop.xlane.xlu0 %112 }
 0x16f   :  { %v116_v27 = vmul.f32 0.03125, %v113_v26  ;;  %v119_v28 = vmul.f32 %v117_v25, %v117_v25 }
 0x171   :  { %v118_v29 = vsub.f32 %v105_v21, %v116_v27  ;;  %v121_v30 = vsel %vm51_vm1, %v119_v28, 0.0 }
 0x172   :  { %122 = vadd.xlane.f32.xlu1 %v121_v30 }
 0x173   :  { %v120_v31 = vmul.f32 %v118_v29, %v118_v29 }
 0x175   :  { %v124_v32 = vsel %vm51_vm1, %v120_v31, 0.0 }
 0x176   :  { %125 = vadd.xlane.f32.xlu1 %v124_v32 }
 0x1fb   :  { %v123_v33 = vpop.xlane.xlu1 %122 }
 0x1fc   :  { %v127_v34 = vmul.f32 0.03125, %v123_v33 }
 0x1fe   :  { %v129_v35 = vadd.f32 1e-12, %v127_v34 }
 0x1ff   :  { %v126_v36 = vpop.xlane.xlu1 %125 }
 0x200   :  { %197 = vrsqrt.f32 %v129_v35  ;;  %v128_v37 = vmul.f32 0.03125, %v126_v36 }
 0x202   :  { %v130_v38 = vadd.f32 1e-12, %v128_v37 }
 0x204   :  { %199 = vrsqrt.f32 %v130_v38 }
 0x20d   :  { %v198_v39 = vpop.eup %197 }
 0x20e   :  { %v133_v41 = vmul.f32 %v198_v39, %v117_v25 }
 0x210   :  { %v141_v43 = vmul.f32 %v171_v40, %v133_v41 }
 0x211   :  { %v200_v44 = vpop.eup %199 }
 0x212   :  { %v149_v45 = vadd.f32 %v172_v42, %v141_v43  ;;  %v134_v46 = vmul.f32 %v200_v44, %v118_v29 }
 0x214   :  { %v175_v47 = vpack.c.bf16 %v149_v45, %v149_v45  ;;  %v142_v48 = vmul.f32 %v171_v40, %v134_v46 }
 0x216   :  { %160 = vst.msk [vmem:[%s267_s5] sm:$0xf] %vm159_vm2, %v175_v47  ;;  %v150_v49 = vadd.f32 %v172_v42, %v142_v48 }
 0x218   :  { %v176_v50 = vpack.c.bf16 %v150_v49, %v150_v49 }
 0x21a   :  { %161 = vst.msk [vmem:[%s267_s5 + $0x4] sm:$0xf] %vm159_vm2, %v176_v50 }

</bundles_post_ra>
